<compile_context>
chip_gen: v7x
topology: tpu7x:2x2x1
jax: 0.10.0
libtpu: 0.0.40
codegen_flags: <defaults>
</compile_context>

<pallas_src>
import functools

import jax
import jax.numpy as jnp
from jax.experimental import pallas as pl
from jax.experimental.pallas import tpu as pltpu


# ----------------------------------------------------------------------------
# Constellation construction (plain JAX "glue"; deterministic, no checkpoints).
# ----------------------------------------------------------------------------
def qam_mapping(bit_count):
    """Square QAM grid, (2**bit_count, 2), unit average symbol energy."""
    assert bit_count % 2 == 0, "square QAM assumed (even bit_count)"
    m = int(2 ** (bit_count // 2))
    levels = (2.0 * jnp.arange(m, dtype=jnp.float32)) - (m - 1)
    I, Q = jnp.meshgrid(levels, levels, indexing="ij")
    pts = jnp.stack([I.reshape(-1), Q.reshape(-1)], axis=1)      # (M, 2)
    norm = jnp.sqrt(jnp.mean(jnp.sum(pts ** 2, axis=1)))
    return pts / norm


def clip_qam_mapping(bit_count, x_clip):
    qam = qam_mapping(bit_count)                                  # (M, 2)
    max_x = jnp.max(jnp.abs(qam[:, 0]))
    cx = qam[:, 0] * (x_clip / max_x)
    x_energy = jnp.sum(cx ** 2)
    cur_y_energy = jnp.sum(qam[:, 1] ** 2)
    result_y_energy = (2.0 ** bit_count) - x_energy
    cy = qam[:, 1] * jnp.sqrt(result_y_energy / cur_y_energy)
    return jnp.stack([cx, cy], axis=1)                            # (M, 2)


def _round_up(a, b):
    return ((a + b - 1) // b) * b


# ----------------------------------------------------------------------------
# Folded kernel: M <= 128 symbols, K = 128 // M points packed per 128-lane row.
# ----------------------------------------------------------------------------
def _clip_qam_folded_kernel(b_ref, msq_ref, x_ref, out_ref, *, m, lg2m):
    # b_ref:   (2K, 128) f32  block-diagonal constant holding -2 * constellation
    # msq_ref: (1, 128)  f32  |mapping[l % M]|^2
    # x_ref:   (TR, 2K)  f32  K points per row, (I, Q) interleaved
    # out_ref: (TR, 128)      folded one-hot; lane l of row r corresponds to
    #                         point r*K + l//M and symbol l % M.
    #
    # metric[r, l] = |m_s|^2 - 2 <x_p, m_s>   (argmin-equivalent to |x_p - m_s|^2)
    metric = jnp.dot(
        x_ref[...], b_ref[...],
        preferred_element_type=jnp.float32,
        precision=jax.lax.Precision.HIGHEST,
    ) + msq_ref[...]

    tr = out_ref.shape[0]
    lane = jax.lax.broadcasted_iota(jnp.int32, (tr, 128), 1)
    seg_pos = lane & (m - 1)          # symbol index inside this point's segment

    # Segmented argmin over each aligned group of `m` lanes: butterfly
    # all-reduce carrying (value, index) so ties resolve to the smallest
    # symbol index (matches torch.argmin's first-minimum tie break).
    val = metric
    idx = seg_pos
    for k in range(lg2m):
        s = 1 << k
        want = lane ^ s               # XOR partner lane (always inside segment)
        a_v = pltpu.roll(val, 128 - s, axis=1)
        b_v = pltpu.roll(val, s, axis=1)
        a_i = pltpu.roll(idx, 128 - s, axis=1)
        b_i = pltpu.roll(idx, s, axis=1)
        # Pick whichever rotation actually delivers the XOR partner at each
        # lane (robust to the rotation direction convention).
        src_a = pltpu.roll(lane, 128 - s, axis=1)
        use_a = src_a == want
        p_v = jnp.where(use_a, a_v, b_v)
        p_i = jnp.where(use_a, a_i, b_i)
        better = (p_v < val) | ((p_v == val) & (p_i < idx))
        val = jnp.where(better, p_v, val)
        idx = jnp.where(better, p_i, idx)

    out_ref[...] = (seg_pos == idx).astype(out_ref.dtype)


# ----------------------------------------------------------------------------
# Wide kernel: M is a multiple of 128 (big constellations), M on the lane axis.
# ----------------------------------------------------------------------------
def _clip_qam_wide_kernel(map_ref, x_ref, out_ref):
    # map_ref: (2, M); x_ref: (TN, 2); out_ref: (TN, M)
    x0 = x_ref[:, 0:1]
    x1 = x_ref[:, 1:2]
    d0 = x0 - map_ref[0:1, :]
    d1 = x1 - map_ref[1:2, :]
    d2 = d0 * d0 + d1 * d1
    idx = jnp.argmin(d2, axis=-1).astype(jnp.int32)
    tn, m = out_ref.shape
    col = jax.lax.broadcasted_iota(jnp.int32, (tn, m), 1)
    out_ref[...] = (col == idx[:, None]).astype(out_ref.dtype)


# ----------------------------------------------------------------------------
# Wrappers.
# ----------------------------------------------------------------------------
def _decode_folded(mapping, x, tile_points, out_dtype):
    M = mapping.shape[0]
    N = x.shape[0]
    K = 128 // M
    lg2m = M.bit_length() - 1

    unit = 8 * K                                   # 8 sublanes * K points/row
    tile_points = _round_up(min(tile_points, _round_up(N, unit)), unit)
    n_pad = _round_up(N, tile_points)
    if n_pad != N:
        x = jnp.concatenate([x, jnp.zeros((n_pad - N, 2), jnp.float32)], axis=0)

    # Tiny constants, built outside the kernel.
    mt = mapping.T                                                  # (2, M)
    eye = jnp.eye(K, dtype=jnp.float32)
    b_mat = jnp.einsum("jk,cm->jckm", eye, -2.0 * mt).reshape(2 * K, 128)
    msq = jnp.tile(jnp.sum(mapping * mapping, axis=1), K).reshape(1, 128)

    x_folded = x.reshape(n_pad // K, 2 * K)        # free row-major reshape
    R = n_pad // K
    TR = tile_points // K

    kernel = functools.partial(_clip_qam_folded_kernel, m=M, lg2m=lg2m)
    out_folded = pl.pallas_call(
        kernel,
        out_shape=jax.ShapeDtypeStruct((R, 128), out_dtype),
        grid_spec=pltpu.PrefetchScalarGridSpec(
            num_scalar_prefetch=0,
            grid=(R // TR,),
            in_specs=[
                pl.BlockSpec((2 * K, 128), lambda i: (0, 0)),   # resident const
                pl.BlockSpec((1, 128), lambda i: (0, 0)),       # resident const
                pl.BlockSpec((TR, 2 * K), lambda i: (i, 0)),    # tile of points
            ],
            out_specs=pl.BlockSpec((TR, 128), lambda i: (i, 0)),
        ),
        compiler_params=pltpu.CompilerParams(
            dimension_semantics=("parallel",),
            vmem_limit_bytes=48 << 20,
        ),
    )(b_mat, msq, x_folded)

    # Free reshape back to the (N, M) one-hot layout; drop padded rows.
    return out_folded.reshape(n_pad, M)[:N]


def _decode_wide(mapping, x, tile_points, out_dtype):
    M = mapping.shape[0]
    N = x.shape[0]
    tile_points = _round_up(min(tile_points, _round_up(N, 8)), 8)
    n_pad = _round_up(N, tile_points)
    if n_pad != N:
        x = jnp.concatenate([x, jnp.zeros((n_pad - N, 2), jnp.float32)], axis=0)
    mapping_t = mapping.T                                          # (2, M)

    out = pl.pallas_call(
        _clip_qam_wide_kernel,
        out_shape=jax.ShapeDtypeStruct((n_pad, M), out_dtype),
        grid_spec=pltpu.PrefetchScalarGridSpec(
            num_scalar_prefetch=0,
            grid=(n_pad // tile_points,),
            in_specs=[
                pl.BlockSpec((2, M), lambda i: (0, 0)),
                pl.BlockSpec((tile_points, 2), lambda i: (i, 0)),
            ],
            out_specs=pl.BlockSpec((tile_points, M), lambda i: (i, 0)),
        ),
        compiler_params=pltpu.CompilerParams(
            dimension_semantics=("parallel",),
            vmem_limit_bytes=48 << 20,
        ),
    )(mapping_t, x)
    return out[:N]


def clip_qam_decoder(mapping, x, *, tile_points=512, out_dtype=jnp.int32):
    """mapping: (M, 2) f32, x: (N, 2) f32  ->  (N, M) one-hot in out_dtype.

    Equivalent to one_hot(argmin(cdist(mapping, x), axis=0), M).
    """
    M = mapping.shape[0]
    mapping = mapping.astype(jnp.float32)
    x = x.astype(jnp.float32)
    if M <= 128 and 128 % M == 0:
        return _decode_folded(mapping, x, tile_points, out_dtype)
    assert M % 128 == 0, "constellation size must divide 128 or be a multiple of 128"
    return _decode_wide(mapping, x, tile_points, out_dtype)


# ----------------------------------------------------------------------------
# Reference (pure JAX) for a sanity check.
# ----------------------------------------------------------------------------
def clip_qam_decoder_ref(mapping, x):
    dist = jnp.sqrt(jnp.sum((mapping[:, None, :] - x[None, :, :]) ** 2, axis=-1))
    idx = jnp.argmin(dist, axis=0)
    return jax.nn.one_hot(idx, mapping.shape[0], dtype=jnp.int32)


if __name__ == "__main__":
    bit_count = 4          # 16-QAM  -> M = 16
    x_clip = 0.5
    N = 1000               # non-multiple of the tile to exercise padding

    mapping = clip_qam_mapping(bit_count, x_clip)             # (16, 2)

    key = jax.random.PRNGKey(0)
    x = jax.random.normal(key, (N, 2), dtype=jnp.float32)     # received symbols

    out = clip_qam_decoder(mapping, x)
    out = jax.block_until_ready(out)

    M = mapping.shape[0]
    assert out.shape == (N, M)
    assert out.dtype == jnp.int32

    ref = clip_qam_decoder_ref(mapping, x)
    if not bool(jnp.array_equal(out, ref)):
        # Only allow disagreement on points that sit (within f32 noise) on a
        # decision boundary; every row must still be a valid one-hot.
        d2 = jnp.sum((x[:, None, :] - mapping[None, :, :]) ** 2, axis=-1)  # (N, M)
        rows = jnp.arange(N)
        gap = jnp.abs(d2[rows, jnp.argmax(out, axis=1)]
                      - d2[rows, jnp.argmax(ref, axis=1)])
        assert bool(jnp.all(jnp.sum(out, axis=1) == 1)), "output is not one-hot"
        assert bool(jnp.all(gap <= 1e-5)), "kernel output mismatch vs reference"

    print("KERNEL_OK")
</pallas_src>

<mosaic_0001>
module attributes {stable_mosaic.version = 11 : i64} {
  func.func @_clip_qam_folded_kernel(%arg0: i32, %arg1: memref<16x128xf32, #tpu.memory_space<vmem>>, %arg2: memref<1x128xf32, #tpu.memory_space<vmem>>, %arg3: memref<64x16xf32, #tpu.memory_space<vmem>>, %arg4: memref<64x128xi32, #tpu.memory_space<vmem>>) attributes {dimension_semantics = [#tpu.dimension_semantics<parallel>], iteration_bounds = array<i64: 2>, scalar_prefetch = 0 : i64, scratch_operands = 0 : i64, tpu.core_type = #tpu.core_type<tc>, window_params = [{pipeline_mode = #tpu.pipeline_mode<synchronous>, transform_indices = @transform_0, window_bounds = array<i64: 16, 128>}, {pipeline_mode = #tpu.pipeline_mode<synchronous>, transform_indices = @transform_1, window_bounds = array<i64: 1, 128>}, {transform_indices = @transform_2, window_bounds = array<i64: 64, 16>}, {transform_indices = @transform_3, window_bounds = array<i64: 64, 128>}]} {
    %c0 = arith.constant 0 : index
    %c0_0 = arith.constant 0 : index
    %0 = vector.load %arg3[%c0, %c0_0] : memref<64x16xf32, #tpu.memory_space<vmem>>, vector<64x16xf32>
    %c0_1 = arith.constant 0 : index
    %c0_2 = arith.constant 0 : index
    %1 = vector.load %arg1[%c0_1, %c0_2] : memref<16x128xf32, #tpu.memory_space<vmem>>, vector<16x128xf32>
    %cst = arith.constant dense<0.000000e+00> : vector<64x128xf32>
    %2 = tpu.matmul %0, %1, %cst {dimension_numbers = #tpu.dot_dimension_numbers<[1], [0], [0], [1], [0, 0, 1, 1], [], []>, precision = #tpu.contract_precision<fp32>} : vector<64x16xf32>, vector<16x128xf32>, vector<64x128xf32> -> vector<64x128xf32>
    %c0_3 = arith.constant 0 : index
    %c0_4 = arith.constant 0 : index
    %3 = vector.load %arg2[%c0_3, %c0_4] : memref<1x128xf32, #tpu.memory_space<vmem>>, vector<1x128xf32>
    %4 = vector.broadcast %3 : vector<1x128xf32> to vector<64x128xf32>
    %5 = arith.addf %2, %4 : vector<64x128xf32>
    %6 = tpu.iota {dimensions = array<i32: 1>} : vector<64x128xi32>
    %c15_i32 = arith.constant 15 : i32
    %7 = vector.broadcast %c15_i32 : i32 to vector<64x128xi32>
    %8 = arith.andi %6, %7 : vector<64x128xi32>
    %c1_i32 = arith.constant 1 : i32
    %9 = vector.broadcast %c1_i32 : i32 to vector<64x128xi32>
    %10 = arith.xori %6, %9 : vector<64x128xi32>
    %c127_i32 = arith.constant 127 : i32
    %11 = tpu.dynamic_rotate %5 by %c127_i32 dim 1 : vector<64x128xf32>, i32 -> vector<64x128xf32>
    %c1_i32_5 = arith.constant 1 : i32
    %12 = tpu.dynamic_rotate %5 by %c1_i32_5 dim 1 : vector<64x128xf32>, i32 -> vector<64x128xf32>
    %c127_i32_6 = arith.constant 127 : i32
    %13 = tpu.dynamic_rotate %8 by %c127_i32_6 dim 1 : vector<64x128xi32>, i32 -> vector<64x128xi32>
    %c1_i32_7 = arith.constant 1 : i32
    %14 = tpu.dynamic_rotate %8 by %c1_i32_7 dim 1 : vector<64x128xi32>, i32 -> vector<64x128xi32>
    %c127_i32_8 = arith.constant 127 : i32
    %15 = tpu.dynamic_rotate %6 by %c127_i32_8 dim 1 : vector<64x128xi32>, i32 -> vector<64x128xi32>
    %16 = arith.cmpi eq, %15, %10 : vector<64x128xi32>
    %17 = arith.select %16, %11, %12 : vector<64x128xi1>, vector<64x128xf32>
    %18 = arith.select %16, %13, %14 : vector<64x128xi1>, vector<64x128xi32>
    %19 = arith.cmpf olt, %17, %5 : vector<64x128xf32>
    %20 = arith.cmpf oeq, %17, %5 : vector<64x128xf32>
    %21 = arith.cmpi slt, %18, %8 : vector<64x128xi32>
    %22 = arith.andi %20, %21 : vector<64x128xi1>
    %23 = arith.ori %19, %22 : vector<64x128xi1>
    %24 = arith.select %23, %17, %5 : vector<64x128xi1>, vector<64x128xf32>
    %25 = arith.select %23, %18, %8 : vector<64x128xi1>, vector<64x128xi32>
    %c2_i32 = arith.constant 2 : i32
    %26 = vector.broadcast %c2_i32 : i32 to vector<64x128xi32>
    %27 = arith.xori %6, %26 : vector<64x128xi32>
    %c126_i32 = arith.constant 126 : i32
    %28 = tpu.dynamic_rotate %24 by %c126_i32 dim 1 : vector<64x128xf32>, i32 -> vector<64x128xf32>
    %c2_i32_9 = arith.constant 2 : i32
    %29 = tpu.dynamic_rotate %24 by %c2_i32_9 dim 1 : vector<64x128xf32>, i32 -> vector<64x128xf32>
    %c126_i32_10 = arith.constant 126 : i32
    %30 = tpu.dynamic_rotate %25 by %c126_i32_10 dim 1 : vector<64x128xi32>, i32 -> vector<64x128xi32>
    %c2_i32_11 = arith.constant 2 : i32
    %31 = tpu.dynamic_rotate %25 by %c2_i32_11 dim 1 : vector<64x128xi32>, i32 -> vector<64x128xi32>
    %c126_i32_12 = arith.constant 126 : i32
    %32 = tpu.dynamic_rotate %6 by %c126_i32_12 dim 1 : vector<64x128xi32>, i32 -> vector<64x128xi32>
    %33 = arith.cmpi eq, %32, %27 : vector<64x128xi32>
    %34 = arith.select %33, %28, %29 : vector<64x128xi1>, vector<64x128xf32>
    %35 = arith.select %33, %30, %31 : vector<64x128xi1>, vector<64x128xi32>
    %36 = arith.cmpf olt, %34, %24 : vector<64x128xf32>
    %37 = arith.cmpf oeq, %34, %24 : vector<64x128xf32>
    %38 = arith.cmpi slt, %35, %25 : vector<64x128xi32>
    %39 = arith.andi %37, %38 : vector<64x128xi1>
    %40 = arith.ori %36, %39 : vector<64x128xi1>
    %41 = arith.select %40, %34, %24 : vector<64x128xi1>, vector<64x128xf32>
    %42 = arith.select %40, %35, %25 : vector<64x128xi1>, vector<64x128xi32>
    %c4_i32 = arith.constant 4 : i32
    %43 = vector.broadcast %c4_i32 : i32 to vector<64x128xi32>
    %44 = arith.xori %6, %43 : vector<64x128xi32>
    %c124_i32 = arith.constant 124 : i32
    %45 = tpu.dynamic_rotate %41 by %c124_i32 dim 1 : vector<64x128xf32>, i32 -> vector<64x128xf32>
    %c4_i32_13 = arith.constant 4 : i32
    %46 = tpu.dynamic_rotate %41 by %c4_i32_13 dim 1 : vector<64x128xf32>, i32 -> vector<64x128xf32>
    %c124_i32_14 = arith.constant 124 : i32
    %47 = tpu.dynamic_rotate %42 by %c124_i32_14 dim 1 : vector<64x128xi32>, i32 -> vector<64x128xi32>
    %c4_i32_15 = arith.constant 4 : i32
    %48 = tpu.dynamic_rotate %42 by %c4_i32_15 dim 1 : vector<64x128xi32>, i32 -> vector<64x128xi32>
    %c124_i32_16 = arith.constant 124 : i32
    %49 = tpu.dynamic_rotate %6 by %c124_i32_16 dim 1 : vector<64x128xi32>, i32 -> vector<64x128xi32>
    %50 = arith.cmpi eq, %49, %44 : vector<64x128xi32>
    %51 = arith.select %50, %45, %46 : vector<64x128xi1>, vector<64x128xf32>
    %52 = arith.select %50, %47, %48 : vector<64x128xi1>, vector<64x128xi32>
    %53 = arith.cmpf olt, %51, %41 : vector<64x128xf32>
    %54 = arith.cmpf oeq, %51, %41 : vector<64x128xf32>
    %55 = arith.cmpi slt, %52, %42 : vector<64x128xi32>
    %56 = arith.andi %54, %55 : vector<64x128xi1>
    %57 = arith.ori %53, %56 : vector<64x128xi1>
    %58 = arith.select %57, %51, %41 : vector<64x128xi1>, vector<64x128xf32>
    %59 = arith.select %57, %52, %42 : vector<64x128xi1>, vector<64x128xi32>
    %c8_i32 = arith.constant 8 : i32
    %60 = vector.broadcast %c8_i32 : i32 to vector<64x128xi32>
    %61 = arith.xori %6, %60 : vector<64x128xi32>
    %c120_i32 = arith.constant 120 : i32
    %62 = tpu.dynamic_rotate %58 by %c120_i32 dim 1 : vector<64x128xf32>, i32 -> vector<64x128xf32>
    %c8_i32_17 = arith.constant 8 : i32
    %63 = tpu.dynamic_rotate %58 by %c8_i32_17 dim 1 : vector<64x128xf32>, i32 -> vector<64x128xf32>
    %c120_i32_18 = arith.constant 120 : i32
    %64 = tpu.dynamic_rotate %59 by %c120_i32_18 dim 1 : vector<64x128xi32>, i32 -> vector<64x128xi32>
    %c8_i32_19 = arith.constant 8 : i32
    %65 = tpu.dynamic_rotate %59 by %c8_i32_19 dim 1 : vector<64x128xi32>, i32 -> vector<64x128xi32>
    %c120_i32_20 = arith.constant 120 : i32
    %66 = tpu.dynamic_rotate %6 by %c120_i32_20 dim 1 : vector<64x128xi32>, i32 -> vector<64x128xi32>
    %67 = arith.cmpi eq, %66, %61 : vector<64x128xi32>
    %68 = arith.select %67, %62, %63 : vector<64x128xi1>, vector<64x128xf32>
    %69 = arith.select %67, %64, %65 : vector<64x128xi1>, vector<64x128xi32>
    %70 = arith.cmpf olt, %68, %58 : vector<64x128xf32>
    %71 = arith.cmpf oeq, %68, %58 : vector<64x128xf32>
    %72 = arith.cmpi slt, %69, %59 : vector<64x128xi32>
    %73 = arith.andi %71, %72 : vector<64x128xi1>
    %74 = arith.ori %70, %73 : vector<64x128xi1>
    %75 = arith.select %74, %69, %59 : vector<64x128xi1>, vector<64x128xi32>
    %76 = arith.cmpi eq, %8, %75 : vector<64x128xi32>
    %77 = arith.extui %76 : vector<64x128xi1> to vector<64x128xi32>
    %c0_21 = arith.constant 0 : index
    %c0_22 = arith.constant 0 : index
    %78 = vector.load %arg4[%c0_21, %c0_22] : memref<64x128xi32, #tpu.memory_space<vmem>>, vector<64x128xi32>
    tpu.vector_store %arg4[%c0_21, %c0_22], %77 {strides = array<i32>} : memref<64x128xi32, #tpu.memory_space<vmem>>, vector<64x128xi32>,
    return
  }
  func.func @transform_0(%arg0: i32) -> (i32, i32) {
    %c0_i32 = arith.constant 0 : i32
    %c0_i32_0 = arith.constant 0 : i32
    %c0_i32_1 = arith.constant 0 : i32
    return %c0_i32, %c0_i32_0 : i32, i32
  }
  func.func @transform_1(%arg0: i32) -> (i32, i32) {
    %c0_i32 = arith.constant 0 : i32
    %c0_i32_0 = arith.constant 0 : i32
    %c0_i32_1 = arith.constant 0 : i32
    return %c0_i32, %c0_i32_0 : i32, i32
  }
  func.func @transform_2(%arg0: i32) -> (i32, i32) {
    %c0_i32 = arith.constant 0 : i32
    %c0_i32_0 = arith.constant 0 : i32
    return %arg0, %c0_i32 : i32, i32
  }
  func.func @transform_3(%arg0: i32) -> (i32, i32) {
    %c0_i32 = arith.constant 0 : i32
    %c0_i32_0 = arith.constant 0 : i32
    return %arg0, %c0_i32 : i32, i32
  }
}

</mosaic_0001>

<bundles_post_ra>
// kernel: tpu_custom_call.1
= control target key start
LH: loop header
LB: loop body
LE: loop exit
PB: predicated region body
PF: predicated region fallthrough
CT: control target
= control target key end

     0   :  { %8 = vsyncpa [#allocation3], 0  ;;  %s2972_s0 = inlined_call_operand.vmem [shape: f32[16,128], index: 0, kind: input, shape index: {}]   ;;  %s2973_s1 = inlined_call_operand.vmem [shape: f32[1,128], index: 1, kind: input, shape index: {}]   ;;  %s2974_s2 = inlined_call_operand.vmem [shape: f32[128,16], index: 2, kind: input, shape index: {}]   ;;  %s2975_s3 = inlined_call_operand.hbm [shape: s32[128,128], index: 3, kind: output, shape index: {}]  }
   0x1   :  { %10 = vsyncpa [#allocation3 + $0x1], 0  ;;  %s1973_s12 = smov 0   ;;  %s1975_s13 = smov 0  }
   0x2   :  { %s1977_s14 = smov 0   ;;  %s1979_s15 = smov 0  }
   0x3 LB: > { %s1994_s16 = sadd.s32 4294967295, %s1940_s15   ;;  %s1587_s17 = sadd.s32 4294967294, %s1940_s15   ;;  %s1940_s15 = sphi %s1979_s15, %s3009_s15   ;;  %s1936_s14 = sphi %s1977_s14, %s3008_s14   ;;  %s1932_s13 = sphi %s1975_s13, %s3007_s13   ;;  %s1928_s12 = sphi %s1973_s12, %s3006_s12  }
   0x4   : > { %s1998_s18 = sadd.s32 1, %s1940_s15   ;;  %s91_s19 = sadd.s32 1, %s1936_s14 }
   0x5   : > { %s88_s20 = ssub.s32 %s1940_s15, %s1998_s18  ;;  %p101_p0 = scmp.ne.s32.totalorder %s1936_s14, %s1932_s13 }
   0x6   : > { %p89_p1 = scmp.eq.s32.totalorder %s88_s20, 0  ;;  %p102_p2 = scmp.eq.s32.totalorder %s1994_s16, 1 }
   0x7   : > { %p107_p3 = scmp.ne.s32.totalorder %s1932_s13, %s1928_s12  ;;  %p108_p4 = scmp.eq.s32.totalorder %s1587_s17, 1 }
   0x8   : > { %s2009_s21 = scalar_select %p89_p1, %s1936_s14, %s91_s19  }
   0x9   : > { %p2011_p5 = por %p102_p2, %p101_p0  ;;  %p2015_p6 = por %p108_p4, %p107_p3 }
   0xa   : > { %p1590_p7 = scmp.ge.s32.totalorder %s1940_s15, 1  ;;  %p141_p8 = scmp.lt.s32.totalorder %s1940_s15, 3 }
   0xc   : > { %p142_p9 = pnand %p1590_p7, %p141_p8 }
   0xd   : > { %v180_v0 = vld [vmem:[%s2972_s0] sm:$0xff] (!%p142_p9)  ;;  %v181_v1 = vld [vmem:[%s2972_s0 + $0x8] sm:$0xff] (!%p142_p9)  ;;  %s1592_s28 = sshll.u32 (!%p142_p9), %s1994_s16, 3  ;;  %v974_v2 = vlaneseq (!%p142_p9)  ;;  %s1942_s29 = smov (!%p142_p9), 127   ;;  %vm189_vm0 = vcmask (!%p142_p9), 130048  }
   0xe   : > { %145 = sbr.rel (%p142_p9) target bundleno = 872 (0x368), region = 32  ;;  %v215_v3 = vand.u32 (!%p142_p9), 4294901760, %v180_v0  ;;  %v218_v4 = vand.u32 (!%p142_p9), 4294901760, %v181_v1  ;;  %p166_p10 = scmp.lt.s32.totalorder (!%p142_p9), %s1592_s28, 15 }
   0xf   : > { %v2028_v5 = vand.u32 (!%p142_p9), 127, %v974_v2  ;;  %s1943_s7 = smov (!%p142_p9), 1   ;;  %s1944_s8 = smov (!%p142_p9), 126  }
  0x10   : > { %v2030_v6 = vpack.c.bf16 (!%p142_p9), %v218_v4, %v215_v3  ;;  %v2032_v7 = vsub.f32 (!%p142_p9), %v180_v0, %v215_v3  ;;  %v2034_v8 = vsub.f32 (!%p142_p9), %v181_v1, %v218_v4  ;;  %s1945_s9 = smov (!%p142_p9), 124   ;;  %s1946_s17 = smov (!%p142_p9), 2  }
  0x11   : > { %1014 = vrot.lane.b32.xlu0 (!%p142_p9), %v2028_v5, %s1942_s29  ;;  %v2039_v9 = vand.u32 (!%p142_p9), 15, %v2028_v5  ;;  %s1947_s19 = smov (!%p142_p9), 120   ;;  %s1948_s20 = smov (!%p142_p9), 4  }
  0x12   : > { %1770 = vmatprep.subr.bf16.mxu0 (!%p142_p9), %v2030_v6  ;;  %1758 = vmatprep.subr.bf16.mxu1 (!%p142_p9), %v2030_v6  ;;  %v364_v10 = vand.u32 (!%p142_p9), 4294901760, %v2032_v7  ;;  %v371_v11 = vand.u32 (!%p142_p9), 4294901760, %v2034_v8  ;;  %v1765_v1 = vpack.c.bf16 (!%p142_p9), %v2034_v8, %v2032_v7  ;;  %s1949_s24 = smov (!%p142_p9), 8   ;;  %s162_s25 = sand.u32 (!%p142_p9), 1, %s1932_s13  }
  0x13   : > { %1772 = vmatpush3.bf16.msra.mxu0 (!%p142_p9), %v2030_v6  ;;  %1760 = vmatpush3.bf16.msra.mxu1 (!%p142_p9), %v2030_v6  ;;  %s1591_s26 = sshll.u32 (!%p142_p9), %s162_s25, 6 }
  0x14   : > { %v365_v14 = vsub.f32 (!%p142_p9), %v2032_v7, %v364_v10  ;;  %v372_v15 = vsub.f32 (!%p142_p9), %v2034_v8, %v371_v11  ;;  %v1773_v17 = vpack.c.bf16 (!%p142_p9), %v371_v11, %v364_v10  ;;  %1010 = vrot.lane.b32.xlu1 (!%p142_p9), %v2039_v9, %s1942_s29  ;;  %s2846_s27 = scalar_lea.vmem (!%p142_p9), [#allocation2], %s1591_s26 }
  0x15   : > { %s3011_s28 = smov (!%p166_p10, %s1592_s28), 15  ;;  %1012 = vrot.lane.b32.xlu0 %v2039_v9, %s1943_s7 }
  0x16   : > { %s1593_s30 = sshll.u32 %s3011_s28, 3  ;;  %v366_v26 = vand.u32 4294901760, %v365_v14  ;;  %v373_v27 = vand.u32 4294901760, %v372_v15  ;;  %1774 = vmatprep.subr.bf16.mxu0 %v1773_v17  ;;  %v1594_v15 = vld [vmem:[%s2973_s1] ss:$0 sm:$0xff]  ;;  %s1600_s28 = sshll.u32 %s1994_s16, 10 }
  0x17   : > { %s2049_s6 = scalar_lea.vmem %s2974_s2, %s1593_s30  ;;  %s2920_s5 = scalar_lea.hbm %s2975_s3, %s1600_s28 }
  0x18   : > { %v172_v12 = vld [vmem:[%s2049_s6] sm:$0xff]  ;;  %v173_v13 = vld [vmem:[%s2049_s6 + $0x8] sm:$0xff]  ;;  %v174_v16 = vld [vmem:[%s2049_s6 + $0x10] sm:$0xff]  ;;  %v1761_v35 = vpack.c.bf16 %v373_v27, %v366_v26  ;;  %1280 = vrot.lane.b32.xlu1 %v2028_v5, %s1945_s9  ;;  %s2930_s16 = scalar_lea.sflag [#allocation3], %s162_s25 }
  0x19   : > { %v191_v18 = vsel %vm189_vm0, %v172_v12, 0  ;;  %v194_v19 = vsel %vm189_vm0, %v173_v13, 0  ;;  %v197_v20 = vsel %vm189_vm0, %v174_v16, 0  ;;  %v175_v21 = vld [vmem:[%s2049_s6 + $0x18] sm:$0xff]  ;;  %v176_v22 = vld [vmem:[%s2049_s6 + $0x20] sm:$0xff]  ;;  %v177_v23 = vld [vmem:[%s2049_s6 + $0x28] sm:$0xff]  ;;  %1140 = vrot.lane.b32.xlu0 %v2028_v5, %s1944_s8 }
  0x1a   : > { %v2067_v24 = vand.u32 4294901760, %v191_v18  ;;  %v2069_v25 = vand.u32 4294901760, %v194_v19  ;;  %v178_v28 = vld [vmem:[%s2049_s6 + $0x30] sm:$0xff]  ;;  %v2072_v29 = vand.u32 4294901760, %v197_v20  ;;  %v200_v30 = vsel %vm189_vm0, %v175_v21, 0  ;;  %v179_v37 = vld [vmem:[%s2049_s6 + $0x38] sm:$0xff]  ;;  %1762 = vmatprep.subr.bf16.mxu1 %v1761_v35 }
  0x1b   : > { %v203_v31 = vsel %vm189_vm0, %v176_v22, 0  ;;  %v206_v32 = vsel %vm189_vm0, %v177_v23, 0  ;;  %v2083_v36 = vand.u32 4294901760, %v200_v30  ;;  %v209_v41 = vsel %vm189_vm0, %v178_v28, 0 }
  0x1c   : > { %v2078_v33 = vsub.f32 %v191_v18, %v2067_v24  ;;  %v2081_v34 = vsub.f32 %v194_v19, %v2069_v25  ;;  %v2087_v38 = vsub.f32 %v197_v20, %v2072_v29  ;;  %v2089_v39 = vand.u32 4294901760, %v203_v31 }
  0x1d   : > { %v2091_v40 = vand.u32 4294901760, %v206_v32  ;;  %v2097_v44 = vsub.f32 %v200_v30, %v2083_v36  ;;  %v2099_v45 = vand.u32 4294901760, %v209_v41  ;;  %v212_v49 = vsel %vm189_vm0, %v179_v37, 0 }
  0x1e   : > { %v283_v42 = vand.u32 4294901760, %v2078_v33  ;;  %v293_v43 = vand.u32 4294901760, %v2081_v34  ;;  %v303_v46 = vand.u32 4294901760, %v2087_v38  ;;  %v2103_v47 = vsub.f32 %v203_v31, %v2089_v39 }
  0x1f   : > { %v2106_v48 = vsub.f32 %v206_v32, %v2091_v40  ;;  %v313_v52 = vand.u32 4294901760, %v2097_v44  ;;  %v2113_v53 = vsub.f32 %v209_v41, %v2099_v45  ;;  %v2118_v57 = vand.u32 4294901760, %v212_v49 }
  0x20   : > { %1713 = vmatprep.mubr.f32.mxu0 %v283_v42  ;;  %v284_v50 = vsub.f32 %v2078_v33, %v283_v42  ;;  %v294_v51 = vsub.f32 %v2081_v34, %v293_v43  ;;  %v304_v54 = vsub.f32 %v2087_v38, %v303_v46  ;;  %v323_v55 = vand.u32 4294901760, %v2103_v47 }
  0x21   : > { %1714 = vmatmul.mubr.f32.vlgmr.msra.gmra.mrb[0].mxu0 %v293_v43  ;;  %v333_v56 = vand.u32 4294901760, %v2106_v48  ;;  %v314_v60 = vsub.f32 %v2097_v44, %v313_v52  ;;  %v343_v61 = vand.u32 4294901760, %v2113_v53  ;;  %v352_v0 = vsub.f32 %v212_v49, %v2118_v57 }
  0x22   : > { %v285_v58 = vand.u32 4294901760, %v284_v50  ;;  %1716 = vmatprep.mubr.f32.mxu0 %v303_v46  ;;  %v295_v59 = vand.u32 4294901760, %v294_v51  ;;  %1776 = vmatpush3.bf16.msra.mxu0 %v1773_v17  ;;  %v305_v62 = vand.u32 4294901760, %v304_v54  ;;  %v324_v63 = vsub.f32 %v2103_v47, %v323_v55 }
  0x23   : > { %1778 = vmatprep.subr.bf16.mxu0 %v2030_v6  ;;  %v315_v2 = vand.u32 4294901760, %v314_v60  ;;  %v334_v3 = vsub.f32 %v2106_v48, %v333_v56  ;;  %v353_v4 = vand.u32 4294901760, %v352_v0  ;;  %v344_v11 = vsub.f32 %v2113_v53, %v343_v61 }
  0x24   : > { %1665 = vmatprep.mubr.f32.mxu1 %v285_v58  ;;  %v325_v10 = vand.u32 4294901760, %v324_v63  ;;  %v977_v49 = vxor.u32 1, %v2028_v5 }
  0x25   : > { %1666 = vmatmul.mubr.f32.vlgmr.msra.gmra.mrb[0].mxu1 %v295_v59  ;;  %1717 = vmatmul.mubr.f32.gmra.mrb[2].mxu0 %v313_v52  ;;  %v335_v12 = vand.u32 4294901760, %v334_v3  ;;  %v354_v7 = vsub.f32 %v352_v0, %v353_v4  ;;  %v345_v8 = vand.u32 4294901760, %v344_v11 }
  0x26   : > { %1764 = vmatpush3.bf16.msra.mxu1 %v1761_v35  ;;  %1668 = vmatprep.mubr.f32.mxu1 %v305_v62 }
  0x27   : > { %1719 = vmatprep.mubr.f32.mxu0 %v323_v55  ;;  %1766 = vmatprep.subr.bf16.mxu1 %v1765_v1  ;;  %v355_v13 = vand.u32 4294901760, %v354_v7 }
  0x29   : > { %1669 = vmatmul.mubr.f32.gmra.mrb[2].mxu1 %v315_v2  ;;  %1720 = vmatmul.mubr.f32.gmra.mrb[4].mxu0 %v333_v56 }
  0x2a   : > { %1671 = vmatprep.mubr.f32.mxu1 %v325_v10  ;;  %1722 = vmatprep.mubr.f32.mxu0 %v343_v61 }
  0x2d   : > { %1672 = vmatmul.mubr.f32.gmra.mrb[4].mxu1 %v335_v12  ;;  %1723 = vmatmul.mubr.f32.gmra.mrb[6].mxu0 %v353_v4 }
  0x2e   : > { %1674 = vmatprep.mubr.f32.mxu1 %v345_v8  ;;  %1729 = vmatprep.mubr.f32.mxu0 %v2067_v24 }
  0x31   : > { %1675 = vmatmul.mubr.f32.gmra.mrb[6].mxu1 %v355_v13  ;;  %1730 = vmatmul.mubr.f32.vlgmr.msra.gmra.mrb[0].mxu0 %v2069_v25 }
  0x32   : > { %1681 = vmatprep.mubr.f32.mxu1 %v2067_v24  ;;  %1732 = vmatprep.mubr.f32.mxu0 %v2072_v29 }
  0x33   : > { %1780 = vmatpush3.bf16.msra.mxu0 %v2030_v6 }
  0x35   : > { %1682 = vmatmul.mubr.f32.vlgmr.msra.gmra.mrb[0].mxu1 %v2069_v25  ;;  %1733 = vmatmul.mubr.f32.gmra.mrb[2].mxu0 %v2083_v36 }
  0x36   : > { %1768 = vmatpush3.bf16.msra.mxu1 %v1765_v1  ;;  %1684 = vmatprep.mubr.f32.mxu1 %v2072_v29 }
  0x37   : > { %1735 = vmatprep.mubr.f32.mxu0 %v2089_v39 }
  0x39   : > { %1685 = vmatmul.mubr.f32.gmra.mrb[2].mxu1 %v2083_v36  ;;  %1736 = vmatmul.mubr.f32.gmra.mrb[4].mxu0 %v2091_v40 }
  0x3a   : > { %1687 = vmatprep.mubr.f32.mxu1 %v2089_v39  ;;  %1738 = vmatprep.mubr.f32.mxu0 %v2099_v45 }
  0x3d   : > { %1688 = vmatmul.mubr.f32.gmra.mrb[4].mxu1 %v2091_v40  ;;  %1739 = vmatmul.mubr.f32.gmra.mrb[6].mxu0 %v2118_v57 }
  0x3e   : > { %1690 = vmatprep.mubr.f32.mxu1 %v2099_v45  ;;  %1745 = vmatprep.mubr.f32.mxu0 %v2067_v24 }
  0x41   : > { %1691 = vmatmul.mubr.f32.gmra.mrb[6].mxu1 %v2118_v57  ;;  %1746 = vmatmul.mubr.f32.vlgmr.msra.gmra.mrb[0].mxu0 %v2069_v25 }
  0x42   : > { %1697 = vmatprep.mubr.f32.mxu1 %v2078_v33  ;;  %1748 = vmatprep.mubr.f32.mxu0 %v2072_v29 }
  0x45   : > { %1698 = vmatmul.mubr.f32.vlgmr.msra.gmra.mrb[0].mxu1 %v2081_v34  ;;  %1749 = vmatmul.mubr.f32.gmra.mrb[2].mxu0 %v2083_v36 }
  0x46   : > { %1700 = vmatprep.mubr.f32.mxu1 %v2087_v38  ;;  %1751 = vmatprep.mubr.f32.mxu0 %v2089_v39 }
  0x49   : > { %1701 = vmatmul.mubr.f32.gmra.mrb[2].mxu1 %v2097_v44  ;;  %1752 = vmatmul.mubr.f32.gmra.mrb[4].mxu0 %v2091_v40 }
  0x4a   : > { %1703 = vmatprep.mubr.f32.mxu1 %v2103_v47  ;;  %1754 = vmatprep.mubr.f32.mxu0 %v2099_v45 }
  0x4d   : > { %1704 = vmatmul.mubr.f32.gmra.mrb[4].mxu1 %v2106_v48  ;;  %1755 = vmatmul.mubr.f32.gmra.mrb[6].mxu0 %v2118_v57 }
  0x4e   : > { %1706 = vmatprep.mubr.f32.mxu1 %v2113_v53 }
  0x51   : > { %1707 = vmatmul.mubr.f32.gmra.mrb[6].mxu1 %v352_v0 }
  0x83   : > { %v1015_v46 = vpop.permute.xlu0 %1014 }
  0x84   : > { %vm2217_vm1 = vcmp.eq.s32.totalorder %v1015_v46, %v977_v49 }
  0x86   : > { %v1011_v48 = vpop.permute.xlu1 %1010 }
  0x87   : > { %v1013_v47 = vpop.permute.xlu0 %1012 }
  0x88   : > { %v2223_v53 = vsel %vm2217_vm1, %v1011_v48, %v1013_v47 }
  0x89   : > { %vm2229_vm2 = vcmp.lt.s32.totalorder %v2223_v53, %v2039_v9 }
  0x8a   : > { %v2215_v51 = vpop.permute.xlu1 %1280 }
  0x8b   : > { %v2213_v50 = vpop.permute.xlu0 %1140 }
 0x114   : > { %v1747_v6 = vpop.f32.mrb[0].mxu0 }
 0x115   : > { %v928_v14 = vpop.f32.mrb[1].mxu0 }
 0x118   : > { %v1699_v16 = vpop.f32.mrb[0].mxu1  ;;  %v1750_v17 = vpop.f32.mrb[2].mxu0 }
 0x119   : > { %v1781_v18 = vadd.f32 %v1699_v16, %v1594_v15  ;;  %v556_v19 = vpop.f32.mrb[1].mxu1  ;;  %v940_v20 = vpop.f32.mrb[3].mxu0 }
 0x11a   : > { %v1783_v21 = vadd.f32 %v1594_v15, %v556_v19 }
 0x11b   : > { %v1782_v22 = vadd.f32 %v1781_v18, %v1747_v6 }
 0x11c   : > { %v2168_v23 = vadd.f32 %v1783_v21, %v928_v14  ;;  %v1702_v24 = vpop.f32.mrb[2].mxu1  ;;  %v1753_v25 = vpop.f32.mrb[4].mxu0 }
 0x11d   : > { %v1785_v26 = vadd.f32 %v1702_v24, %v1594_v15  ;;  %v952_v27 = vpop.f32.mrb[5].mxu0  ;;  %996 = vrot.lane.b32.xlu0 %v1782_v22, %s1943_s7  ;;  %980 = vrot.lane.b32.xlu1 %v1782_v22, %s1942_s29  ;;  %v570_v28 = vpop.f32.mrb[3].mxu1 }
 0x11e   : > { %v1787_v29 = vadd.f32 %v1594_v15, %v570_v28 }
 0x11f   : > { %v2172_v30 = vadd.f32 %v1785_v26, %v1750_v17 }
 0x120   : > { %v2174_v31 = vadd.f32 %v1787_v29, %v940_v20  ;;  %v1705_v32 = vpop.f32.mrb[4].mxu1  ;;  %v1756_v33 = vpop.f32.mrb[6].mxu0 }
 0x121   : > { %v1789_v34 = vadd.f32 %v1705_v32, %v1594_v15  ;;  %v964_v35 = vpop.f32.mrb[7].mxu0  ;;  %994 = vrot.lane.b32.xlu1 %v2168_v23, %s1943_s7  ;;  %978 = vrot.lane.b32.xlu0 %v2168_v23, %s1942_s29  ;;  %v584_v36 = vpop.f32.mrb[5].mxu1 }
 0x122   : > { %v1791_v37 = vadd.f32 %v1594_v15, %v584_v36 }
 0x123   : > { %v2180_v38 = vadd.f32 %v1789_v34, %v1753_v25 }
 0x124   : > { %v2182_v39 = vadd.f32 %v1791_v37, %v952_v27  ;;  %v1708_v40 = vpop.f32.mrb[6].mxu1 }
 0x125   : > { %v1793_v41 = vadd.f32 %v1708_v40, %v1594_v15  ;;  %984 = vrot.lane.b32.xlu0 %v2172_v30, %s1942_s29  ;;  %982 = vrot.lane.b32.xlu1 %v2174_v31, %s1942_s29  ;;  %v598_v42 = vpop.f32.mrb[7].mxu1 }
 0x126   : > { %v1795_v43 = vadd.f32 %v1594_v15, %v598_v42 }
 0x127   : > { %v2188_v44 = vadd.f32 %v1793_v41, %v1756_v33 }
 0x128   : > { %v2190_v45 = vadd.f32 %v1795_v43, %v964_v35 }
 0x129   : > { %1000 = vrot.lane.b32.xlu0 %v2172_v30, %s1943_s7  ;;  %998 = vrot.lane.b32.xlu1 %v2174_v31, %s1943_s7 }
 0x12d   : > { %988 = vrot.lane.b32.xlu0 %v2180_v38, %s1942_s29  ;;  %986 = vrot.lane.b32.xlu1 %v2182_v39, %s1942_s29 }
 0x131   : > { %1004 = vrot.lane.b32.xlu0 %v2180_v38, %s1943_s7  ;;  %1002 = vrot.lane.b32.xlu1 %v2182_v39, %s1943_s7 }
 0x135   : > { %992 = vrot.lane.b32.xlu0 %v2188_v44, %s1942_s29  ;;  %990 = vrot.lane.b32.xlu1 %v2190_v45, %s1942_s29  ;;  %s1525_s29 = sshll.u32 %s2846_s27, 4  ;;  %s2924_s29 = int_to_ptr.vmem [resolvable:$true] %s1525_s29 }
 0x136   : > { %s1878_s6 = scalar_lea.vmem %s2924_s29, 1024 }
 0x137   : > { %p1879_p11 = scmp.ne.s32.totalorder %s2924_s29, %s1878_s6 }
 0x139   : > { %1008 = vrot.lane.b32.xlu0 %v2188_v44, %s1943_s7  ;;  %1006 = vrot.lane.b32.xlu1 %v2190_v45, %s1943_s7  ;;  %p1880_p12 = pnand %p1879_p11, %p2011_p5  ;;  %s1951_s7 = smov [#allocation2]  }
 0x13b   : > { %p1881_p13 = pneg %p1880_p12 }
 0x18f   : > { %v997_v54 = vpop.permute.xlu0 %996  ;;  %v981_v55 = vpop.permute.xlu1 %980 }
 0x190   : > { %v1018_v56 = vsel %vm2217_vm1, %v981_v55, %v997_v54 }
 0x191   : > { %vm1027_vm3 = vcmp.lt.f32.partialorder %v1018_v56, %v1782_v22  ;;  %vm1035_vm4 = vcmp.eq.f32.partialorder %v1018_v56, %v1782_v22 }
 0x192   : > { %vm1044_vm5 = vmand %vm1035_vm4, %vm2229_vm2 }
 0x193   : > { %vm1052_vm6 = vmor %vm1027_vm3, %vm1044_vm5  ;;  %v995_v58 = vpop.permute.xlu1 %994  ;;  %v979_v59 = vpop.permute.xlu0 %978 }
 0x194   : > { %v2235_v60 = vsel %vm1052_vm6, %v1018_v56, %v1782_v22  ;;  %v1017_v61 = vsel %vm2217_vm1, %v979_v59, %v995_v58  ;;  %v2252_v1 = vsel %vm1052_vm6, %v2223_v53, %v2039_v9 }
 0x195   : > { %vm1026_vm7 = vcmp.lt.f32.partialorder %v1017_v61, %v2168_v23  ;;  %vm1034_vm8 = vcmp.eq.f32.partialorder %v1017_v61, %v2168_v23  ;;  %1078 = vrot.lane.b32.xlu0 %v2235_v60, %s1944_s8  ;;  %1094 = vrot.lane.b32.xlu1 %v2235_v60, %s1946_s17 }
 0x196   : > { %vm1043_vm9 = vmand %vm1034_vm8, %vm2229_vm2 }
 0x197   : > { %vm1051_vm10 = vmor %vm1026_vm7, %vm1043_vm9  ;;  %v985_v62 = vpop.permute.xlu0 %984  ;;  %v983_v63 = vpop.permute.xlu1 %982 }
 0x198   : > { %v2248_v0 = vsel %vm1051_vm10, %v1017_v61, %v2168_v23  ;;  %v2264_v11 = vsel %vm1051_vm10, %v2223_v53, %v2039_v9 }
 0x199   : > { %1092 = vrot.lane.b32.xlu0 %v2248_v0, %s1946_s17  ;;  %1110 = vrot.lane.b32.xlu1 %v2252_v1, %s1944_s8 }
 0x19b   : > { %v1001_v2 = vpop.permute.xlu0 %1000  ;;  %v999_v3 = vpop.permute.xlu1 %998 }
 0x19c   : > { %v1020_v4 = vsel %vm2217_vm1, %v985_v62, %v1001_v2  ;;  %v1019_v10 = vsel %vm2217_vm1, %v983_v63, %v999_v3 }
 0x19d   : > { %vm1037_vm11 = vcmp.eq.f32.partialorder %v1020_v4, %v2172_v30  ;;  %vm1036_vm12 = vcmp.eq.f32.partialorder %v1019_v10, %v2174_v31  ;;  %1108 = vrot.lane.b32.xlu0 %v2264_v11, %s1944_s8  ;;  %vm1028_vm13 = vcmp.lt.f32.partialorder %v1019_v10, %v2174_v31  ;;  %1126 = vrot.lane.b32.xlu1 %v2252_v1, %s1946_s17 }
 0x19e   : > { %vm1029_vm14 = vcmp.lt.f32.partialorder %v1020_v4, %v2172_v30  ;;  %vm1046_vm15 = vmand %vm1037_vm11, %vm2229_vm2 }
 0x19f   : > { %v987_v12 = vpop.permute.xlu1 %986  ;;  %vm1045_vm0 = vmand %vm1036_vm12, %vm2229_vm2  ;;  %v989_v6 = vpop.permute.xlu0 %988 }
 0x1a0   : > { %vm1053_vm3 = vmor %vm1028_vm13, %vm1045_vm0 }
 0x1a1   : > { %1124 = vrot.lane.b32.xlu0 %v2264_v11, %s1946_s17  ;;  %vm2280_vm4 = vmor %vm1029_vm14, %vm1046_vm15  ;;  %1076 = vrot.lane.b32.xlu1 %v2248_v0, %s1944_s8  ;;  %v2287_v13 = vsel %vm1053_vm3, %v1019_v10, %v2174_v31  ;;  %v2303_v16 = vsel %vm1053_vm3, %v2223_v53, %v2039_v9 }
 0x1a2   : > { %v2294_v15 = vsel %vm2280_vm4, %v1020_v4, %v2172_v30  ;;  %v2324_v21 = vsel %vm2280_vm4, %v2223_v53, %v2039_v9 }
 0x1a3   : > { %v1003_v8 = vpop.permute.xlu1 %1002  ;;  %v1005_v17 = vpop.permute.xlu0 %1004 }
 0x1a4   : > { %v1021_v14 = vsel %vm2217_vm1, %v987_v12, %v1003_v8  ;;  %v1022_v19 = vsel %vm2217_vm1, %v989_v6, %v1005_v17 }
 0x1a5   : > { %1096 = vrot.lane.b32.xlu0 %v2287_v13, %s1946_s17  ;;  %1082 = vrot.lane.b32.xlu1 %v2294_v15, %s1944_s8  ;;  %vm1038_vm5 = vcmp.eq.f32.partialorder %v1021_v14, %v2182_v39  ;;  %vm1030_vm6 = vcmp.lt.f32.partialorder %v1021_v14, %v2182_v39  ;;  %vm1039_vm9 = vcmp.eq.f32.partialorder %v1022_v19, %v2180_v38 }
 0x1a6   : > { %vm1047_vm7 = vmand %vm1038_vm5, %vm2229_vm2  ;;  %vm1031_vm10 = vcmp.lt.f32.partialorder %v1022_v19, %v2180_v38 }
 0x1a7   : > { %v991_v18 = vpop.permute.xlu1 %990  ;;  %vm2314_vm8 = vmor %vm1030_vm6, %vm1047_vm7  ;;  %v993_v24 = vpop.permute.xlu0 %992 }
 0x1a8   : > { %v2332_v22 = vsel %vm2314_vm8, %v1021_v14, %v2182_v39  ;;  %vm1048_vm11 = vmand %vm1039_vm9, %vm2229_vm2  ;;  %v2356_v27 = vsel %vm2314_vm8, %v2223_v53, %v2039_v9 }
 0x1a9   : > { %1112 = vrot.lane.b32.xlu0 %v2303_v16, %s1944_s8  ;;  %1098 = vrot.lane.b32.xlu1 %v2294_v15, %s1946_s17  ;;  %vm2345_vm12 = vmor %vm1031_vm10, %vm1048_vm11 }
 0x1aa   : > { %v2361_v28 = vsel %vm2345_vm12, %v1022_v19, %v2180_v38  ;;  %v2384_v32 = vsel %vm2345_vm12, %v2223_v53, %v2039_v9  ;;  %v1075_v38 = vxor.u32 2, %v2028_v5 }
 0x1ab   : > { %v1007_v23 = vpop.permute.xlu1 %1006  ;;  %v1009_v29 = vpop.permute.xlu0 %1008 }
 0x1ac   : > { %v1023_v25 = vsel %vm2217_vm1, %v991_v18, %v1007_v23  ;;  %v1024_v30 = vsel %vm2217_vm1, %v993_v24, %v1009_v29 }
 0x1ad   : > { %1128 = vrot.lane.b32.xlu0 %v2303_v16, %s1946_s17  ;;  %1114 = vrot.lane.b32.xlu1 %v2324_v21, %s1944_s8  ;;  %vm1040_vm13 = vcmp.eq.f32.partialorder %v1023_v25, %v2190_v45  ;;  %vm1032_vm14 = vcmp.lt.f32.partialorder %v1023_v25, %v2190_v45  ;;  %vm1041_vm3 = vcmp.eq.f32.partialorder %v1024_v30, %v2188_v44 }
 0x1ae   : > { %vm1049_vm15 = vmand %vm1040_vm13, %vm2229_vm2  ;;  %vm1033_vm1 = vcmp.lt.f32.partialorder %v1024_v30, %v2188_v44 }
 0x1af   : > { %vm1057_vm0 = vmor %vm1032_vm14, %vm1049_vm15 }
 0x1b0   : > { %v2378_v31 = vsel %vm1057_vm0, %v1023_v25, %v2190_v45  ;;  %vm1050_vm4 = vmand %vm1041_vm3, %vm2229_vm2  ;;  %v2399_v33 = vsel %vm1057_vm0, %v2223_v53, %v2039_v9  ;;  %vm2424_vm2 = vcmp.eq.s32.totalorder %v2213_v50, %v1075_v38 }
 0x1b1   : > { %1084 = vrot.lane.b32.xlu0 %v2332_v22, %s1944_s8  ;;  %1130 = vrot.lane.b32.xlu1 %v2324_v21, %s1946_s17  ;;  %vm1058_vm5 = vmor %vm1033_vm1, %vm1050_vm4 }
 0x1b2   : > { %v2402_v34 = vsel %vm1058_vm5, %v1024_v30, %v2188_v44  ;;  %v2414_v35 = vsel %vm1058_vm5, %v2223_v53, %v2039_v9 }
 0x1b5   : > { %1100 = vrot.lane.b32.xlu0 %v2332_v22, %s1946_s17  ;;  %1080 = vrot.lane.b32.xlu1 %v2287_v13, %s1944_s8 }
 0x1b9   : > { %1116 = vrot.lane.b32.xlu0 %v2356_v27, %s1944_s8  ;;  %1086 = vrot.lane.b32.xlu1 %v2361_v28, %s1944_s8 }
 0x1bd   : > { %1132 = vrot.lane.b32.xlu0 %v2356_v27, %s1946_s17  ;;  %1102 = vrot.lane.b32.xlu1 %v2361_v28, %s1946_s17 }
 0x1c1   : > { %1088 = vrot.lane.b32.xlu0 %v2378_v31, %s1944_s8  ;;  %1118 = vrot.lane.b32.xlu1 %v2384_v32, %s1944_s8 }
 0x1c5   : > { %1104 = vrot.lane.b32.xlu0 %v2378_v31, %s1946_s17  ;;  %1134 = vrot.lane.b32.xlu1 %v2384_v32, %s1946_s17 }
 0x1c9   : > { %1120 = vrot.lane.b32.xlu0 %v2399_v33, %s1944_s8  ;;  %1090 = vrot.lane.b32.xlu1 %v2402_v34, %s1944_s8 }
 0x1cd   : > { %1136 = vrot.lane.b32.xlu0 %v2399_v33, %s1946_s17  ;;  %1106 = vrot.lane.b32.xlu1 %v2402_v34, %s1946_s17 }
 0x1d1   : > { %1122 = vrot.lane.b32.xlu1 %v2414_v35, %s1944_s8  ;;  %s1882_s8 = sshll.u32 %s1951_s7, 4  ;;  %s1883_s8 = int_to_ptr.vmem [resolvable:$false] %s1882_s8 }
 0x1d2   : > { %p1885_p0 = scmp.lt.s32.totalorder %s2924_s29, %s1883_s8 }
 0x1d5   : > { %1138 = vrot.lane.b32.xlu1 %v2414_v35, %s1946_s17 }
 0x1d9   : > { %1420 = vrot.lane.b32.xlu1 %v2028_v5, %s1947_s19 }
 0x207   : > { %v1079_v36 = vpop.permute.xlu0 %1078  ;;  %v1095_v37 = vpop.permute.xlu1 %1094 }
 0x208   : > { %v1144_v42 = vsel %vm2424_vm2, %v1079_v36, %v1095_v37 }
 0x209   : > { %vm1168_vm6 = vcmp.eq.f32.partialorder %v1144_v42, %v2235_v60  ;;  %vm1160_vm8 = vcmp.lt.f32.partialorder %v1144_v42, %v2235_v60 }
 0x20b   : > { %v1093_v39 = vpop.permute.xlu0 %1092  ;;  %v1111_v40 = vpop.permute.xlu1 %1110 }
 0x20f   : > { %v1109_v43 = vpop.permute.xlu0 %1108  ;;  %v1127_v44 = vpop.permute.xlu1 %1126 }
 0x210   : > { %v1152_v45 = vsel %vm2424_vm2, %v1111_v40, %v1127_v44 }
 0x211   : > { %vm1176_vm7 = vcmp.lt.s32.totalorder %v1152_v45, %v2252_v1 }
 0x212   : > { %vm1184_vm9 = vmand %vm1168_vm6, %vm1176_vm7 }
 0x213   : > { %v1125_v46 = vpop.permute.xlu0 %1124  ;;  %vm2435_vm10 = vmor %vm1160_vm8, %vm1184_vm9  ;;  %v1077_v49 = vpop.permute.xlu1 %1076 }
 0x214   : > { %v1151_v48 = vsel %vm2424_vm2, %v1109_v43, %v1125_v46  ;;  %v1143_v50 = vsel %vm2424_vm2, %v1077_v49, %v1093_v39  ;;  %v2447_v52 = vsel %vm2435_vm10, %v1144_v42, %v2235_v60  ;;  %v2463_v58 = vsel %vm2435_vm10, %v1152_v45, %v2252_v1 }
 0x215   : > { %vm1175_vm11 = vcmp.lt.s32.totalorder %v1151_v48, %v2264_v11  ;;  %vm1159_vm12 = vcmp.lt.f32.partialorder %v1143_v50, %v2248_v0  ;;  %vm1167_vm13 = vcmp.eq.f32.partialorder %v1143_v50, %v2248_v0  ;;  %1218 = vrot.lane.b32.xlu0 %v2447_v52, %s1945_s9 }
 0x216   : > { %vm1183_vm14 = vmand %vm1167_vm13, %vm1175_vm11 }
 0x217   : > { %v1097_v53 = vpop.permute.xlu0 %1096  ;;  %vm1191_vm15 = vmor %vm1159_vm12, %vm1183_vm14  ;;  %v1083_v54 = vpop.permute.xlu1 %1082 }
 0x218   : > { %v2454_v55 = vsel %vm1191_vm15, %v1143_v50, %v2248_v0  ;;  %v2466_v59 = vsel %vm1191_vm15, %v1151_v48, %v2264_v11 }
 0x219   : > { %1234 = vrot.lane.b32.xlu0 %v2447_v52, %s1948_s20  ;;  %1232 = vrot.lane.b32.xlu1 %v2454_v55, %s1948_s20 }
 0x21b   : > { %v1113_v56 = vpop.permute.xlu0 %1112  ;;  %v1099_v57 = vpop.permute.xlu1 %1098 }
 0x21c   : > { %v1146_v62 = vsel %vm2424_vm2, %v1083_v54, %v1099_v57 }
 0x21d   : > { %1250 = vrot.lane.b32.xlu0 %v2463_v58, %s1945_s9  ;;  %1248 = vrot.lane.b32.xlu1 %v2466_v59, %s1945_s9  ;;  %vm1170_vm0 = vcmp.eq.f32.partialorder %v1146_v62, %v2294_v15  ;;  %vm1162_vm1 = vcmp.lt.f32.partialorder %v1146_v62, %v2294_v15 }
 0x21f   : > { %v1129_v60 = vpop.permute.xlu0 %1128  ;;  %v1115_v61 = vpop.permute.xlu1 %1114 }
 0x220   : > { %v1153_v2 = vsel %vm2424_vm2, %v1113_v56, %v1129_v60 }
 0x221   : > { %1266 = vrot.lane.b32.xlu0 %v2463_v58, %s1948_s20  ;;  %1264 = vrot.lane.b32.xlu1 %v2466_v59, %s1948_s20  ;;  %vm1177_vm6 = vcmp.lt.s32.totalorder %v1153_v2, %v2303_v16 }
 0x223   : > { %v1085_v63 = vpop.permute.xlu0 %1084  ;;  %v1131_v0 = vpop.permute.xlu1 %1130 }
 0x224   : > { %v1154_v1 = vsel %vm2424_vm2, %v1115_v61, %v1131_v0  ;;  %v1355_v61 = vxor.u32 8, %v2028_v5 }
 0x225   : > { %vm1178_vm3 = vcmp.lt.s32.totalorder %v1154_v1, %v2324_v21  ;;  %1216 = vrot.lane.b32.xlu0 %v2454_v55, %s1945_s9 }
 0x226   : > { %vm1186_vm4 = vmand %vm1170_vm0, %vm1178_vm3 }
 0x227   : > { %v1101_v3 = vpop.permute.xlu0 %1100  ;;  %vm2487_vm5 = vmor %vm1162_vm1, %vm1186_vm4  ;;  %v1081_v10 = vpop.permute.xlu1 %1080 }
 0x228   : > { %v1145_v11 = vsel %vm2424_vm2, %v1081_v10, %v1097_v53  ;;  %v2496_v12 = vsel %vm2487_vm5, %v1146_v62, %v2294_v15  ;;  %v2515_v18 = vsel %vm2487_vm5, %v1154_v1, %v2324_v21 }
 0x229   : > { %vm1161_vm7 = vcmp.lt.f32.partialorder %v1145_v11, %v2287_v13  ;;  %vm1169_vm8 = vcmp.eq.f32.partialorder %v1145_v11, %v2287_v13  ;;  %1222 = vrot.lane.b32.xlu0 %v2496_v12, %s1945_s9 }
 0x22a   : > { %vm1185_vm9 = vmand %vm1169_vm8, %vm1177_vm6 }
 0x22b   : > { %v1117_v7 = vpop.permute.xlu0 %1116  ;;  %vm1193_vm10 = vmor %vm1161_vm7, %vm1185_vm9  ;;  %v1087_v8 = vpop.permute.xlu1 %1086 }
 0x22c   : > { %v2504_v6 = vsel %vm1193_vm10, %v1145_v11, %v2287_v13  ;;  %v1147_v13 = vsel %vm2424_vm2, %v1085_v63, %v1101_v3  ;;  %v2525_v23 = vsel %vm1193_vm10, %v1153_v2, %v2303_v16 }
 0x22d   : > { %1238 = vrot.lane.b32.xlu0 %v2496_v12, %s1948_s20  ;;  %1220 = vrot.lane.b32.xlu1 %v2504_v6, %s1945_s9  ;;  %vm1171_vm12 = vcmp.eq.f32.partialorder %v1147_v13, %v2332_v22  ;;  %vm1163_vm14 = vcmp.lt.f32.partialorder %v1147_v13, %v2332_v22 }
 0x22f   : > { %v1133_v14 = vpop.permute.xlu0 %1132  ;;  %v1103_v15 = vpop.permute.xlu1 %1102 }
 0x230   : > { %v1155_v17 = vsel %vm2424_vm2, %v1117_v7, %v1133_v14  ;;  %v1148_v21 = vsel %vm2424_vm2, %v1087_v8, %v1103_v15 }
 0x231   : > { %1254 = vrot.lane.b32.xlu0 %v2515_v18, %s1945_s9  ;;  %1236 = vrot.lane.b32.xlu1 %v2504_v6, %s1948_s20  ;;  %vm1179_vm11 = vcmp.lt.s32.totalorder %v1155_v17, %v2356_v27  ;;  %vm1172_vm0 = vcmp.eq.f32.partialorder %v1148_v21, %v2361_v28  ;;  %vm1164_vm1 = vcmp.lt.f32.partialorder %v1148_v21, %v2361_v28 }
 0x232   : > { %vm1187_vm13 = vmand %vm1171_vm12, %vm1179_vm11 }
 0x233   : > { %v1089_v19 = vpop.permute.xlu0 %1088  ;;  %v1119_v20 = vpop.permute.xlu1 %1118  ;;  %vm2537_vm15 = vmor %vm1163_vm14, %vm1187_vm13 }
 0x234   : > { %v2549_v36 = vsel %vm2537_vm15, %v1147_v13, %v2332_v22  ;;  %v2570_v42 = vsel %vm2537_vm15, %v1155_v17, %v2356_v27 }
 0x235   : > { %1270 = vrot.lane.b32.xlu0 %v2515_v18, %s1948_s20  ;;  %1252 = vrot.lane.b32.xlu1 %v2525_v23, %s1945_s9 }
 0x237   : > { %v1105_v24 = vpop.permute.xlu0 %1104  ;;  %v1135_v25 = vpop.permute.xlu1 %1134 }
 0x238   : > { %v1156_v16 = vsel %vm2424_vm2, %v1119_v20, %v1135_v25  ;;  %v1149_v22 = vsel %vm2424_vm2, %v1089_v19, %v1105_v24 }
 0x239   : > { %vm1180_vm3 = vcmp.lt.s32.totalorder %v1156_v16, %v2384_v32  ;;  %1268 = vrot.lane.b32.xlu1 %v2525_v23, %s1948_s20  ;;  %vm1173_vm7 = vcmp.eq.f32.partialorder %v1149_v22, %v2378_v31  ;;  %vm1165_vm9 = vcmp.lt.f32.partialorder %v1149_v22, %v2378_v31 }
 0x23a   : > { %vm1188_vm4 = vmand %vm1172_vm0, %vm1180_vm3 }
 0x23b   : > { %v1121_v29 = vpop.permute.xlu0 %1120  ;;  %vm1196_vm5 = vmor %vm1164_vm1, %vm1188_vm4  ;;  %v1091_v30 = vpop.permute.xlu1 %1090 }
 0x23c   : > { %v2552_v37 = vsel %vm1196_vm5, %v1148_v21, %v2361_v28  ;;  %v2573_v43 = vsel %vm1196_vm5, %v1156_v16, %v2384_v32 }
 0x23d   : > { %1224 = vrot.lane.b32.xlu1 %v2549_v36, %s1945_s9  ;;  %1226 = vrot.lane.b32.xlu0 %v2552_v37, %s1945_s9 }
 0x23f   : > { %v1137_v38 = vpop.permute.xlu0 %1136  ;;  %v1107_v39 = vpop.permute.xlu1 %1106 }
 0x240   : > { %v1157_v40 = vsel %vm2424_vm2, %v1121_v29, %v1137_v38  ;;  %v1150_v44 = vsel %vm2424_vm2, %v1091_v30, %v1107_v39 }
 0x241   : > { %1240 = vrot.lane.b32.xlu1 %v2549_v36, %s1948_s20  ;;  %1242 = vrot.lane.b32.xlu0 %v2552_v37, %s1948_s20  ;;  %vm1181_vm6 = vcmp.lt.s32.totalorder %v1157_v40, %v2399_v33  ;;  %vm1174_vm11 = vcmp.eq.f32.partialorder %v1150_v44, %v2402_v34  ;;  %vm1166_vm13 = vcmp.lt.f32.partialorder %v1150_v44, %v2402_v34 }
 0x242   : > { %vm1189_vm8 = vmand %vm1173_vm7, %vm1181_vm6 }
 0x243   : > { %v1123_v28 = vpop.permute.xlu1 %1122  ;;  %vm1197_vm10 = vmor %vm1165_vm9, %vm1189_vm8 }
 0x244   : > { %v2593_v32 = vsel %vm1197_vm10, %v1149_v22, %v2378_v31  ;;  %v2607_v46 = vsel %vm1197_vm10, %v1157_v40, %v2399_v33 }
 0x245   : > { %1256 = vrot.lane.b32.xlu1 %v2570_v42, %s1945_s9  ;;  %1258 = vrot.lane.b32.xlu0 %v2573_v43, %s1945_s9 }
 0x247   : > { %v1139_v45 = vpop.permute.xlu1 %1138 }
 0x248   : > { %v1158_v27 = vsel %vm2424_vm2, %v1123_v28, %v1139_v45 }
 0x249   : > { %vm1182_vm12 = vcmp.lt.s32.totalorder %v1158_v27, %v2414_v35  ;;  %1272 = vrot.lane.b32.xlu1 %v2570_v42, %s1948_s20  ;;  %1274 = vrot.lane.b32.xlu0 %v2573_v43, %s1948_s20 }
 0x24a   : > { %vm1190_vm14 = vmand %vm1174_vm11, %vm1182_vm12 }
 0x24b   : > { %vm1198_vm15 = vmor %vm1166_vm13, %vm1190_vm14 }
 0x24c   : > { %v2596_v41 = vsel %vm1198_vm15, %v1150_v44, %v2402_v34  ;;  %v2610_v31 = vsel %vm1198_vm15, %v1158_v27, %v2414_v35  ;;  %v2620_v34 = vpop.permute.xlu1 %1420  ;;  %v1215_v35 = vxor.u32 4, %v2028_v5 }
 0x24d   : > { %1228 = vrot.lane.b32.xlu1 %v2593_v32, %s1945_s9  ;;  %1230 = vrot.lane.b32.xlu0 %v2596_v41, %s1945_s9 }
 0x24e   : > { %vm2624_vm2 = vcmp.eq.s32.totalorder %v2215_v51, %v1215_v35 }
 0x251   : > { %1244 = vrot.lane.b32.xlu1 %v2593_v32, %s1948_s20  ;;  %1246 = vrot.lane.b32.xlu0 %v2596_v41, %s1948_s20 }
 0x255   : > { %1260 = vrot.lane.b32.xlu1 %v2607_v46, %s1945_s9  ;;  %1262 = vrot.lane.b32.xlu0 %v2610_v31, %s1945_s9  ;;  %s1884_s9 = scalar_lea.vmem %s1883_s8, 2048 }
 0x256   : > { %p1886_p1 = scmp.lt.s32.totalorder %s1884_s9, %s1878_s6 }
 0x258   : > { %p1887_p2 = por %p1886_p1, %p1885_p0 }
 0x259   : > { %1276 = vrot.lane.b32.xlu1 %v2607_v46, %s1948_s20  ;;  %1278 = vrot.lane.b32.xlu0 %v2610_v31, %s1948_s20 }
 0x25a   : > { %p1888_p3 = pnand %p1887_p2, %p1881_p13 }
 0x287   : > { %v1219_v47 = vpop.permute.xlu0 %1218 }
 0x28b   : > { %v1235_v33 = vpop.permute.xlu0 %1234  ;;  %v1233_v48 = vpop.permute.xlu1 %1232 }
 0x28c   : > { %v1284_v54 = vsel %vm2624_vm2, %v1219_v47, %v1235_v33 }
 0x28d   : > { %vm1308_vm0 = vcmp.eq.f32.partialorder %v1284_v54, %v2447_v52  ;;  %vm1300_vm1 = vcmp.lt.f32.partialorder %v1284_v54, %v2447_v52 }
 0x28f   : > { %v1251_v49 = vpop.permute.xlu0 %1250  ;;  %v1249_v50 = vpop.permute.xlu1 %1248 }
 0x293   : > { %v1267_v56 = vpop.permute.xlu0 %1266  ;;  %v1265_v57 = vpop.permute.xlu1 %1264 }
 0x294   : > { %v1292_v60 = vsel %vm2624_vm2, %v1251_v49, %v1267_v56  ;;  %v1291_v51 = vsel %vm2624_vm2, %v1249_v50, %v1265_v57 }
 0x295   : > { %vm1316_vm3 = vcmp.lt.s32.totalorder %v1292_v60, %v2463_v58  ;;  %vm1315_vm6 = vcmp.lt.s32.totalorder %v1291_v51, %v2466_v59 }
 0x296   : > { %vm1324_vm4 = vmand %vm1308_vm0, %vm1316_vm3 }
 0x297   : > { %vm2637_vm5 = vmor %vm1300_vm1, %vm1324_vm4  ;;  %v1217_v62 = vpop.permute.xlu0 %1216 }
 0x298   : > { %v1283_v63 = vsel %vm2624_vm2, %v1217_v62, %v1233_v48  ;;  %v2646_v0 = vsel %vm2637_vm5, %v1284_v54, %v2447_v52  ;;  %v2663_v4 = vsel %vm2637_vm5, %v1292_v60, %v2463_v58 }
 0x299   : > { %vm1299_vm7 = vcmp.lt.f32.partialorder %v1283_v63, %v2454_v55  ;;  %vm1307_vm8 = vcmp.eq.f32.partialorder %v1283_v63, %v2454_v55  ;;  %1358 = vrot.lane.b32.xlu1 %v2646_v0, %s1947_s19 }
 0x29a   : > { %vm1323_vm9 = vmand %vm1307_vm8, %vm1315_vm6 }
 0x29b   : > { %vm1331_vm10 = vmor %vm1299_vm7, %vm1323_vm9  ;;  %v1223_v1 = vpop.permute.xlu0 %1222 }
 0x29c   : > { %v2654_v2 = vsel %vm1331_vm10, %v1283_v63, %v2454_v55  ;;  %v2670_v11 = vsel %vm1331_vm10, %v1291_v51, %v2466_v59 }
 0x29d   : > { %1374 = vrot.lane.b32.xlu1 %v2646_v0, %s1949_s24  ;;  %1356 = vrot.lane.b32.xlu0 %v2654_v2, %s1947_s19 }
 0x29f   : > { %v1239_v52 = vpop.permute.xlu0 %1238  ;;  %v1221_v3 = vpop.permute.xlu1 %1220 }
 0x2a0   : > { %v1286_v58 = vsel %vm2624_vm2, %v1223_v1, %v1239_v52 }
 0x2a1   : > { %1390 = vrot.lane.b32.xlu1 %v2663_v4, %s1947_s19  ;;  %1372 = vrot.lane.b32.xlu0 %v2654_v2, %s1949_s24  ;;  %vm1310_vm11 = vcmp.eq.f32.partialorder %v1286_v58, %v2496_v12  ;;  %vm1302_vm13 = vcmp.lt.f32.partialorder %v1286_v58, %v2496_v12 }
 0x2a3   : > { %v1255_v55 = vpop.permute.xlu0 %1254  ;;  %v1237_v10 = vpop.permute.xlu1 %1236 }
 0x2a4   : > { %v1285_v59 = vsel %vm2624_vm2, %v1221_v3, %v1237_v10 }
 0x2a5   : > { %1406 = vrot.lane.b32.xlu1 %v2663_v4, %s1949_s24  ;;  %1388 = vrot.lane.b32.xlu0 %v2670_v11, %s1947_s19  ;;  %vm1309_vm0 = vcmp.eq.f32.partialorder %v1285_v59, %v2504_v6  ;;  %vm1301_vm1 = vcmp.lt.f32.partialorder %v1285_v59, %v2504_v6 }
 0x2a7   : > { %v1271_v7 = vpop.permute.xlu0 %1270  ;;  %v1253_v8 = vpop.permute.xlu1 %1252 }
 0x2a8   : > { %v1294_v14 = vsel %vm2624_vm2, %v1255_v55, %v1271_v7 }
 0x2a9   : > { %vm1318_vm12 = vcmp.lt.s32.totalorder %v1294_v14, %v2515_v18  ;;  %1404 = vrot.lane.b32.xlu0 %v2670_v11, %s1949_s24 }
 0x2aa   : > { %vm1326_vm14 = vmand %vm1310_vm11, %vm1318_vm12 }
 0x2ab   : > { %vm2687_vm15 = vmor %vm1302_vm13, %vm1326_vm14  ;;  %v1269_v17 = vpop.permute.xlu1 %1268 }
 0x2ac   : > { %v1293_v13 = vsel %vm2624_vm2, %v1253_v8, %v1269_v17  ;;  %v2696_v19 = vsel %vm2687_vm15, %v1286_v58, %v2496_v12  ;;  %v2713_v16 = vsel %vm2687_vm15, %v1294_v14, %v2515_v18 }
 0x2ad   : > { %vm1317_vm3 = vcmp.lt.s32.totalorder %v1293_v13, %v2525_v23  ;;  %1362 = vrot.lane.b32.xlu1 %v2696_v19, %s1947_s19 }
 0x2ae   : > { %vm1325_vm4 = vmand %vm1309_vm0, %vm1317_vm3 }
 0x2af   : > { %vm1333_vm5 = vmor %vm1301_vm1, %vm1325_vm4  ;;  %v1227_v20 = vpop.permute.xlu0 %1226  ;;  %v1225_v21 = vpop.permute.xlu1 %1224 }
 0x2b0   : > { %v2704_v24 = vsel %vm1333_vm5, %v1285_v59, %v2504_v6  ;;  %v2722_v29 = vsel %vm1333_vm5, %v1293_v13, %v2525_v23 }
 0x2b1   : > { %1378 = vrot.lane.b32.xlu1 %v2696_v19, %s1949_s24  ;;  %1360 = vrot.lane.b32.xlu0 %v2704_v24, %s1947_s19 }
 0x2b3   : > { %v1243_v12 = vpop.permute.xlu0 %1242  ;;  %v1241_v25 = vpop.permute.xlu1 %1240 }
 0x2b4   : > { %v1288_v30 = vsel %vm2624_vm2, %v1227_v20, %v1243_v12  ;;  %v1287_v39 = vsel %vm2624_vm2, %v1225_v21, %v1241_v25 }
 0x2b5   : > { %1394 = vrot.lane.b32.xlu1 %v2713_v16, %s1947_s19  ;;  %1376 = vrot.lane.b32.xlu0 %v2704_v24, %s1949_s24  ;;  %vm1312_vm6 = vcmp.eq.f32.partialorder %v1288_v30, %v2552_v37  ;;  %vm1304_vm9 = vcmp.lt.f32.partialorder %v1288_v30, %v2552_v37  ;;  %vm1311_vm11 = vcmp.eq.f32.partialorder %v1287_v39, %v2549_v36 }
 0x2b6   : > { %vm1303_vm13 = vcmp.lt.f32.partialorder %v1287_v39, %v2549_v36 }
 0x2b7   : > { %v1259_v6 = vpop.permute.xlu0 %1258  ;;  %v1257_v26 = vpop.permute.xlu1 %1256 }
 0x2b9   : > { %1410 = vrot.lane.b32.xlu1 %v2713_v16, %s1949_s24  ;;  %1392 = vrot.lane.b32.xlu0 %v2722_v29, %s1947_s19 }
 0x2bb   : > { %v1275_v18 = vpop.permute.xlu0 %1274  ;;  %v1273_v38 = vpop.permute.xlu1 %1272 }
 0x2bc   : > { %v1296_v40 = vsel %vm2624_vm2, %v1259_v6, %v1275_v18  ;;  %v1295_v22 = vsel %vm2624_vm2, %v1257_v26, %v1273_v38 }
 0x2bd   : > { %vm1320_vm7 = vcmp.lt.s32.totalorder %v1296_v40, %v2573_v43  ;;  %vm1319_vm8 = vcmp.lt.s32.totalorder %v1295_v22, %v2570_v42  ;;  %1408 = vrot.lane.b32.xlu0 %v2722_v29, %s1949_s24 }
 0x2be   : > { %vm1328_vm10 = vmand %vm1312_vm6, %vm1320_vm7 }
 0x2bf   : > { %vm2741_vm12 = vmor %vm1304_vm9, %vm1328_vm10  ;;  %v1231_v28 = vpop.permute.xlu0 %1230  ;;  %v1229_v44 = vpop.permute.xlu1 %1228  ;;  %vm2822_vm10 = vcmp.eq.s32.totalorder %v2620_v34, %v1355_v61 }
 0x2c0   : > { %vm1327_vm14 = vmand %vm1311_vm11, %vm1319_vm8  ;;  %v2749_v45 = vsel %vm2741_vm12, %v1288_v30, %v2552_v37  ;;  %v2765_v35 = vsel %vm2741_vm12, %v1296_v40, %v2573_v43 }
 0x2c1   : > { %vm1335_vm15 = vmor %vm1303_vm13, %vm1327_vm14  ;;  %1366 = vrot.lane.b32.xlu1 %v2749_v45, %s1947_s19 }
 0x2c2   : > { %v2754_v27 = vsel %vm1335_vm15, %v1287_v39, %v2549_v36  ;;  %v2772_v49 = vsel %vm1335_vm15, %v1295_v22, %v2570_v42 }
 0x2c3   : > { %1364 = vrot.lane.b32.xlu0 %v2754_v27, %s1947_s19  ;;  %v1247_v47 = vpop.permute.xlu0 %1246  ;;  %v1245_v33 = vpop.permute.xlu1 %1244 }
 0x2c4   : > { %v1290_v36 = vsel %vm2624_vm2, %v1231_v28, %v1247_v47  ;;  %v1289_v56 = vsel %vm2624_vm2, %v1229_v44, %v1245_v33 }
 0x2c5   : > { %1382 = vrot.lane.b32.xlu1 %v2749_v45, %s1949_s24  ;;  %vm1314_vm0 = vcmp.eq.f32.partialorder %v1290_v36, %v2596_v41  ;;  %vm1306_vm4 = vcmp.lt.f32.partialorder %v1290_v36, %v2596_v41  ;;  %vm1313_vm6 = vcmp.eq.f32.partialorder %v1289_v56, %v2593_v32 }
 0x2c7   : > { %1380 = vrot.lane.b32.xlu0 %v2754_v27, %s1949_s24  ;;  %v1263_v37 = vpop.permute.xlu0 %1262  ;;  %v1261_v48 = vpop.permute.xlu1 %1260 }
 0x2c9   : > { %1398 = vrot.lane.b32.xlu1 %v2765_v35, %s1947_s19 }
 0x2cb   : > { %1396 = vrot.lane.b32.xlu0 %v2772_v49, %s1947_s19  ;;  %v1279_v50 = vpop.permute.xlu0 %1278  ;;  %v1277_v54 = vpop.permute.xlu1 %1276 }
 0x2cc   : > { %v1298_v43 = vsel %vm2624_vm2, %v1263_v37, %v1279_v50  ;;  %v1297_v57 = vsel %vm2624_vm2, %v1261_v48, %v1277_v54  ;;  %vm1305_vm2 = vcmp.lt.f32.partialorder %v1289_v56, %v2593_v32 }
 0x2cd   : > { %vm1322_vm3 = vcmp.lt.s32.totalorder %v1298_v43, %v2610_v31  ;;  %vm1321_vm1 = vcmp.lt.s32.totalorder %v1297_v57, %v2607_v46  ;;  %1414 = vrot.lane.b32.xlu1 %v2765_v35, %s1949_s24 }
 0x2ce   : > { %vm1330_vm5 = vmand %vm1314_vm0, %vm1322_vm3 }
 0x2cf   : > { %vm1338_vm7 = vmor %vm1306_vm4, %vm1330_vm5  ;;  %1412 = vrot.lane.b32.xlu0 %v2772_v49, %s1949_s24 }
 0x2d0   : > { %vm1329_vm8 = vmand %vm1313_vm6, %vm1321_vm1  ;;  %v2793_v42 = vsel %vm1338_vm7, %v1290_v36, %v2596_v41  ;;  %v2807_v41 = vsel %vm1338_vm7, %v1298_v43, %v2610_v31 }
 0x2d1   : > { %vm1337_vm9 = vmor %vm1305_vm2, %vm1329_vm8  ;;  %1370 = vrot.lane.b32.xlu1 %v2793_v42, %s1947_s19 }
 0x2d2   : > { %v2798_v53 = vsel %vm1337_vm9, %v1289_v56, %v2593_v32  ;;  %v2812_v60 = vsel %vm1337_vm9, %v1297_v57, %v2607_v46 }
 0x2d3   : > { %1368 = vrot.lane.b32.xlu0 %v2798_v53, %s1947_s19 }
 0x2d5   : > { %1386 = vrot.lane.b32.xlu1 %v2793_v42, %s1949_s24 }
 0x2d7   : > { %1384 = vrot.lane.b32.xlu0 %v2798_v53, %s1949_s24 }
 0x2d9   : > { %1402 = vrot.lane.b32.xlu1 %v2807_v41, %s1947_s19 }
 0x2db   : > { %1400 = vrot.lane.b32.xlu0 %v2812_v60, %s1947_s19 }
 0x2dd   : > { %1418 = vrot.lane.b32.xlu1 %v2807_v41, %s1949_s24 }
 0x2df   : > { %1416 = vrot.lane.b32.xlu0 %v2812_v60, %s1949_s24 }
 0x30b   : > { %v1359_v32 = vpop.permute.xlu1 %1358 }
 0x30f   : > { %v1357_v51 = vpop.permute.xlu0 %1356  ;;  %v1375_v31 = vpop.permute.xlu1 %1374 }
 0x310   : > { %v1424_v1 = vsel %vm2822_vm10, %v1359_v32, %v1375_v31 }
 0x311   : > { %vm1448_vm11 = vcmp.eq.f32.partialorder %v1424_v1, %v2646_v0  ;;  %vm1440_vm13 = vcmp.lt.f32.partialorder %v1424_v1, %v2646_v0  ;;  %v1950_v0 = vmov 0  }
 0x313   : > { %v1373_v62 = vpop.permute.xlu0 %1372  ;;  %v1391_v63 = vpop.permute.xlu1 %1390 }
 0x314   : > { %v1423_v5 = vsel %vm2822_vm10, %v1357_v51, %v1373_v62 }
 0x315   : > { %vm1447_vm0 = vcmp.eq.f32.partialorder %v1423_v5, %v2654_v2  ;;  %vm1439_vm4 = vcmp.lt.f32.partialorder %v1423_v5, %v2654_v2 }
 0x317   : > { %v1389_v52 = vpop.permute.xlu0 %1388  ;;  %v1407_v3 = vpop.permute.xlu1 %1406 }
 0x318   : > { %v1432_v55 = vsel %vm2822_vm10, %v1391_v63, %v1407_v3 }
 0x319   : > { %vm1456_vm12 = vcmp.lt.s32.totalorder %v1432_v55, %v2663_v4 }
 0x31a   : > { %vm1464_vm14 = vmand %vm1448_vm11, %vm1456_vm12 }
 0x31b   : > { %vm1472_vm15 = vmor %vm1440_vm13, %vm1464_vm14  ;;  %v1405_v34 = vpop.permute.xlu0 %1404 }
 0x31c   : > { %v1480_v10 = vsel %vm1472_vm15, %v1432_v55, %v2663_v4  ;;  %v1431_v58 = vsel %vm2822_vm10, %v1389_v52, %v1405_v34 }
 0x31d   : > { %vm1488_vm3 = vcmp.eq.s32.totalorder %v2039_v9, %v1480_v10  ;;  %vm1455_vm1 = vcmp.lt.s32.totalorder %v1431_v58, %v2670_v11 }
 0x31e   : > { %v1496_v7 = vsel %vm1488_vm3, 1, %v1950_v0  ;;  %vm1463_vm5 = vmand %vm1447_vm0, %vm1455_vm1 }
 0x31f   : > { %1504 = vst [vmem:[%s2846_s27 + $0x8] sm:$0xff] %v1496_v7  ;;  %vm1471_vm6 = vmor %vm1439_vm4, %vm1463_vm5  ;;  %v1363_v4 = vpop.permute.xlu1 %1362 }
 0x320   : > { %v1479_v8 = vsel %vm1471_vm6, %v1431_v58, %v2670_v11 }
 0x321   : > { %vm1487_vm7 = vcmp.eq.s32.totalorder %v2039_v9, %v1479_v8 }
 0x322   : > { %v1495_v14 = vsel %vm1487_vm7, 1, %v1950_v0 }
 0x323   : > { %1503 = vst [vmem:[%s2846_s27] sm:$0xff] %v1495_v14  ;;  %v1361_v59 = vpop.permute.xlu0 %1360  ;;  %v1379_v2 = vpop.permute.xlu1 %1378 }
 0x324   : > { %v1426_v13 = vsel %vm2822_vm10, %v1363_v4, %v1379_v2 }
 0x325   : > { %vm1450_vm2 = vcmp.eq.f32.partialorder %v1426_v13, %v2696_v19  ;;  %vm1442_vm9 = vcmp.lt.f32.partialorder %v1426_v13, %v2696_v19 }
 0x327   : > { %v1395_v15 = vpop.permute.xlu1 %1394  ;;  %v1377_v17 = vpop.permute.xlu0 %1376 }
 0x328   : > { %v1425_v11 = vsel %vm2822_vm10, %v1361_v59, %v1377_v17 }
 0x329   : > { %vm1449_vm14 = vcmp.eq.f32.partialorder %v1425_v11, %v2704_v24  ;;  %vm1441_vm0 = vcmp.lt.f32.partialorder %v1425_v11, %v2704_v24 }
 0x32b   : > { %v1411_v20 = vpop.permute.xlu1 %1410  ;;  %v1393_v21 = vpop.permute.xlu0 %1392 }
 0x32c   : > { %v1434_v12 = vsel %vm2822_vm10, %v1395_v15, %v1411_v20 }
 0x32d   : > { %vm1458_vm8 = vcmp.lt.s32.totalorder %v1434_v12, %v2713_v16 }
 0x32e   : > { %vm1466_vm11 = vmand %vm1450_vm2, %vm1458_vm8 }
 0x32f   : > { %vm1474_vm12 = vmor %vm1442_vm9, %vm1466_vm11  ;;  %v1409_v6 = vpop.permute.xlu0 %1408 }
 0x330   : > { %v1482_v25 = vsel %vm1474_vm12, %v1434_v12, %v2713_v16  ;;  %v1433_v26 = vsel %vm2822_vm10, %v1393_v21, %v1409_v6 }
 0x331   : > { %vm1490_vm13 = vcmp.eq.s32.totalorder %v2039_v9, %v1482_v25  ;;  %vm1457_vm15 = vcmp.lt.s32.totalorder %v1433_v26, %v2722_v29 }
 0x332   : > { %v1498_v30 = vsel %vm1490_vm13, 1, %v1950_v0  ;;  %vm1465_vm3 = vmand %vm1449_vm14, %vm1457_vm15 }
 0x333   : > { %1506 = vst [vmem:[%s2846_s27 + $0x18] sm:$0xff] %v1498_v30  ;;  %v1367_v19 = vpop.permute.xlu1 %1366  ;;  %vm1473_vm1 = vmor %vm1441_vm0, %vm1465_vm3 }
 0x334   : > { %v1481_v16 = vsel %vm1473_vm1, %v1433_v26, %v2722_v29 }
 0x335   : > { %v1365_v18 = vpop.permute.xlu0 %1364  ;;  %vm1489_vm4 = vcmp.eq.s32.totalorder %v2039_v9, %v1481_v16 }
 0x336   : > { %v1497_v38 = vsel %vm1489_vm4, 1, %v1950_v0 }
 0x337   : > { %v1383_v39 = vpop.permute.xlu1 %1382  ;;  %1505 = vst [vmem:[%s2846_s27 + $0x10] sm:$0xff] %v1497_v38 }
 0x338   : > { %v1428_v28 = vsel %vm2822_vm10, %v1367_v19, %v1383_v39 }
 0x339   : > { %v1381_v40 = vpop.permute.xlu0 %1380  ;;  %vm1452_vm5 = vcmp.eq.f32.partialorder %v1428_v28, %v2749_v45  ;;  %vm1444_vm7 = vcmp.lt.f32.partialorder %v1428_v28, %v2749_v45 }
 0x33a   : > { %v1427_v44 = vsel %vm2822_vm10, %v1365_v18, %v1381_v40 }
 0x33b   : > { %v1399_v22 = vpop.permute.xlu1 %1398  ;;  %vm1451_vm8 = vcmp.eq.f32.partialorder %v1427_v44, %v2754_v27  ;;  %vm1443_vm12 = vcmp.lt.f32.partialorder %v1427_v44, %v2754_v27 }
 0x33d   : > { %v1397_v23 = vpop.permute.xlu0 %1396 }
 0x33f   : > { %v1415_v24 = vpop.permute.xlu1 %1414 }
 0x340   : > { %v1436_v29 = vsel %vm2822_vm10, %v1399_v22, %v1415_v24 }
 0x341   : > { %v1413_v47 = vpop.permute.xlu0 %1412  ;;  %vm1460_vm6 = vcmp.lt.s32.totalorder %v1436_v29, %v2765_v35 }
 0x342   : > { %v1435_v33 = vsel %vm2822_vm10, %v1397_v23, %v1413_v47  ;;  %vm1468_vm2 = vmand %vm1452_vm5, %vm1460_vm6 }
 0x343   : > { %vm1459_vm9 = vcmp.lt.s32.totalorder %v1435_v33, %v2772_v49  ;;  %vm1476_vm11 = vmor %vm1444_vm7, %vm1468_vm2  ;;  %v1371_v37 = vpop.permute.xlu1 %1370 }
 0x344   : > { %vm1467_vm13 = vmand %vm1451_vm8, %vm1459_vm9  ;;  %v1484_v48 = vsel %vm1476_vm11, %v1436_v29, %v2765_v35 }
 0x345   : > { %vm1475_vm14 = vmor %vm1443_vm12, %vm1467_vm13  ;;  %vm1492_vm15 = vcmp.eq.s32.totalorder %v2039_v9, %v1484_v48  ;;  %v1369_v45 = vpop.permute.xlu0 %1368 }
 0x346   : > { %v1483_v36 = vsel %vm1475_vm14, %v1435_v33, %v2772_v49  ;;  %v1500_v50 = vsel %vm1492_vm15, 1, %v1950_v0 }
 0x347   : > { %vm1491_vm0 = vcmp.eq.s32.totalorder %v2039_v9, %v1483_v36  ;;  %1508 = vst [vmem:[%s2846_s27 + $0x28] sm:$0xff] %v1500_v50  ;;  %v1387_v54 = vpop.permute.xlu1 %1386 }
 0x348   : > { %v1499_v56 = vsel %vm1491_vm0, 1, %v1950_v0  ;;  %v1430_v35 = vsel %vm2822_vm10, %v1371_v37, %v1387_v54 }
 0x349   : > { %1507 = vst [vmem:[%s2846_s27 + $0x20] sm:$0xff] %v1499_v56  ;;  %v1385_v43 = vpop.permute.xlu0 %1384  ;;  %vm1454_vm3 = vcmp.eq.f32.partialorder %v1430_v35, %v2793_v42  ;;  %vm1446_vm4 = vcmp.lt.f32.partialorder %v1430_v35, %v2793_v42 }
 0x34a   : > { %v1429_v49 = vsel %vm2822_vm10, %v1369_v45, %v1385_v43 }
 0x34b   : > { %v1403_v27 = vpop.permute.xlu1 %1402  ;;  %vm1453_vm6 = vcmp.eq.f32.partialorder %v1429_v49, %v2798_v53  ;;  %vm1445_vm8 = vcmp.lt.f32.partialorder %v1429_v49, %v2798_v53 }
 0x34d   : > { %v1401_v57 = vpop.permute.xlu0 %1400 }
 0x34f   : > { %v1419_v32 = vpop.permute.xlu1 %1418 }
 0x350   : > { %v1438_v51 = vsel %vm2822_vm10, %v1403_v27, %v1419_v32 }
 0x351   : > { %v1417_v31 = vpop.permute.xlu0 %1416  ;;  %vm1462_vm1 = vcmp.lt.s32.totalorder %v1438_v51, %v2807_v41 }
 0x352   : > { %v1437_v61 = vsel %vm2822_vm10, %v1401_v57, %v1417_v31  ;;  %vm1470_vm5 = vmand %vm1454_vm3, %vm1462_vm1 }
 0x353   : > { %vm1461_vm7 = vcmp.lt.s32.totalorder %v1437_v61, %v2812_v60  ;;  %vm1478_vm2 = vmor %vm1446_vm4, %vm1470_vm5 }
 0x354   : > { %vm1469_vm9 = vmand %vm1453_vm6, %vm1461_vm7  ;;  %v1486_v62 = vsel %vm1478_vm2, %v1438_v51, %v2807_v41 }
 0x355   : > { %vm1477_vm11 = vmor %vm1445_vm8, %vm1469_vm9  ;;  %vm1494_vm10 = vcmp.eq.s32.totalorder %v2039_v9, %v1486_v62 }
 0x356   : > { %v1485_v42 = vsel %vm1477_vm11, %v1437_v61, %v2812_v60  ;;  %v1502_v63 = vsel %vm1494_vm10, 1, %v1950_v0 }
 0x357   : > { %vm1493_vm12 = vcmp.eq.s32.totalorder %v2039_v9, %v1485_v42  ;;  %1510 = vst [vmem:[%s2846_s27 + $0x38] sm:$0xff] %v1502_v63 }
 0x358   : > { %v1501_v53 = vsel %vm1493_vm12, 1, %v1950_v0 }
 0x359   : > { %1509 = vst [vmem:[%s2846_s27 + $0x30] sm:$0xff] %v1501_v53 }
 0x35a   : > { %1891 = shalt.err (!%p1888_p3)
}
 0x35b   : > { %s1892_s10 = scalar_lea.hbm %s2920_s5, 1024  ;;  %s1896_s19 = scalar_lea.hbm %s2975_s3, 2048 }
 0x35c   : > { %p1893_p4 = scmp.ne.s32.totalorder %s2920_s5, %s1892_s10  ;;  %p1897_p9 = scmp.lt.u32.totalorder %s2920_s5, %s2975_s3 }
 0x35d   : > { %p1898_p10 = scmp.lt.u32.totalorder %s1896_s19, %s1892_s10  ;;  %p1900_p12 = scmp.lt.u32.totalorder %s1892_s10, %s2920_s5 }
 0x35e   : > { %p1894_p7 = pnand %p1893_p4, %p2011_p5 }
 0x35f   : > { %p1899_p11 = por %p1898_p10, %p1897_p9 }
 0x360   : > { %p1895_p8 = pneg %p1894_p7 }
 0x361   : > { %p1901_p13 = por %p1900_p12, %p1899_p11 }
 0x363   : > { %p1902_p0 = pnand %p1901_p13, %p1895_p8 }
 0x365   : > { %1905 = shalt.err (!%p1902_p0)
}
 0x366   : > { %s1952_s26 = smov 128  }
 0x367   : > { %1829 = dma.vmem_to_hbm [thread:$0]  (%p2011_p5), %s2924_s29, 1024, %s2920_s5, %s2930_s16, %s1952_s26, %s1952_s26, %s1949_s24  }
 0x368 PF: > { %p1835_p1 = scmp.ge.s32.totalorder %s1940_s15, 2  ;;  %s1540_s27 = sand.u32 1, %s1928_s12  }
 0x369   : > { %s1541_s28 = scalar_lea.sflag [#allocation3], %s1540_s27 }
 0x36a   : > { %p1832_p2 = pnand %p1835_p1, %p2015_p6 }
 0x36c   : > { %1923 = dma.done.wait (!%p1832_p2), %s1541_s28, 1024  }
 0x36d   : > { %1925 = vsyncadd (!%p1832_p2), %s1541_s28, 4294966272  ;;  %p13_p3 = scmp.ge.s32.totalorder %s1998_s18, 4   ;;  %s3006_s12 = smov %s1932_s13 }
 0x36e   : > { %s3007_s13 = smov %s1936_s14  ;;  %s3008_s14 = smov %s2009_s21 }
 0x36f   : > { %s3009_s15 = smov %s1998_s18  ;;  %15 = sbr.rel (!%p13_p3) target bundleno = 3 (0x3), region = 67 }
 0x376   :  { %1546 = vsyncpa [#allocation3], 1 }
 0x377   :  { %1548 = vsyncpa [#allocation3 + $0x1], 1 }

</bundles_post_ra>
